<compile_context>
chip_gen: v7x
topology: tpu7x:2x2x1
jax: 0.10.0
libtpu: 0.0.40
codegen_flags: <defaults>
</compile_context>

<pallas_src>
import jax
import jax.numpy as jnp
import numpy as np
from jax import lax
from jax.experimental import pallas as pl
from jax.experimental.pallas import tpu as pltpu


def _make_kernel(H, W, Cin, Cout, mxu_dtype):
    RS = W + 2                       # row stride of the zero-padded canvas
    L = (H + 2) * RS                 # flattened canvas length (spatial on lanes)
    MARGIN = RS + 1                  # extra zeros so every tap shift is a static slice
    LBUF = L + 2 * MARGIN
    # tap flat offsets, k = kh*3 + kw  (matches weight packing in the wrapper)
    OFFS = [(kh - 1) * RS + (kw - 1) for kh in range(3) for kw in range(3)]

    def im2col(buf_ref, nrows):
        # (9*nrows, L) patch: row-block k is the canvas shifted by OFFS[k].
        # Each piece is a static lane-offset load -- no reshape, no wraparound.
        return jnp.concatenate(
            [buf_ref[:, MARGIN + d: MARGIN + d + L] for d in OFFS], axis=0)

    def kernel(x_ref, w1_ref, b1_ref, w2_ref, b2_ref, mask_ref, o_ref, xbuf, rbuf):
        # xbuf: (Cin,  LBUF) flat zero-padded canvas of x
        # rbuf: (Cout, LBUF) flat zero-padded canvas of r1 = relu(conv1(x))
        xbuf[...] = jnp.zeros_like(xbuf)
        rbuf[...] = jnp.zeros_like(rbuf)

        # Pack x rows into the canvas interior (ring + margins stay zero).
        for r in range(H):
            start = MARGIN + (r + 1) * RS + 1
            xbuf[:, start:start + W] = x_ref[0, :, r, :]

        # ---- fused stage 1: trunk conv3x3 | residual conv1 3x3 | 1x1 shortcut ----
        patch1 = im2col(xbuf, Cin).astype(mxu_dtype)                    # (9*Cin, L)
        y1 = jnp.dot(w1_ref[...], patch1,
                     preferred_element_type=jnp.float32) + b1_ref[...]  # (3*Cout, L)
        trunk = jnp.maximum(y1[0:Cout], 0.0)                            # (Cout, L)
        # interior mask zeroes the canvas ring -> exact zero-padding of r1 for conv2
        r1 = jnp.maximum(y1[Cout:2 * Cout], 0.0) * mask_ref[...]        # (Cout, L)
        sc = y1[2 * Cout:3 * Cout]                                      # (Cout, L)

        # ---- stage 2: conv2 over the zero-padded r1 canvas ----
        rbuf[:, MARGIN:MARGIN + L] = r1
        patch2 = im2col(rbuf, Cout).astype(mxu_dtype)                   # (9*Cout, L)
        r2 = jnp.dot(w2_ref[...], patch2,
                     preferred_element_type=jnp.float32) + b2_ref[...]  # (Cout, L)

        # ---- attention combine: (1 + sigmoid(res)) * trunk ----
        res = r2 + sc
        out = (1.0 + jax.nn.sigmoid(res)) * trunk                       # (Cout, L)
        o_ref[...] = out[None].astype(o_ref.dtype)                      # lane-dense store

    return kernel


def attention_stage3(x_nchw, params, *, mxu_dtype=jnp.float32):
    """x_nchw: (N, Cin, H, W) float32.  Returns (N, Cout, H, W) float32.

    Set mxu_dtype=jnp.bfloat16 on v6e/v7x for ~2x MXU rate (f32 accumulation kept)."""
    N, Cin, H, W = x_nchw.shape
    Cout = params["wt"].shape[-1]
    RS = W + 2
    L = (H + 2) * RS
    LBUF = L + 2 * (RS + 1)

    def taps(w):  # HWIO (3,3,Ci,Co) -> (Co, 9*Ci), tap-major, input-channel fastest
        return jnp.transpose(w, (3, 0, 1, 2)).reshape(w.shape[3], -1)

    # 1x1 shortcut folded into the center tap (k = 4) of the fused stage-1 weights.
    w_sc = jnp.zeros((Cout, 9 * Cin), jnp.float32).at[:, 4 * Cin:5 * Cin].set(params["ws"].T)
    w1 = jnp.concatenate([taps(params["wt"]), taps(params["wr1"]), w_sc], axis=0)
    b1 = jnp.concatenate([params["bt"], params["br1"], params["bs"]]).reshape(3 * Cout, 1)
    w2 = taps(params["wr2"])                       # (Cout, 9*Cout)
    b2 = params["br2"].reshape(Cout, 1)
    w1 = w1.astype(mxu_dtype)
    w2 = w2.astype(mxu_dtype)

    # Interior mask of the flat canvas (1 on the HxW interior, 0 on the zero ring).
    mask = (jnp.zeros((H + 2, W + 2), jnp.float32)
            .at[1:H + 1, 1:W + 1].set(1.0).reshape(1, L))

    kernel = _make_kernel(H, W, Cin, Cout, mxu_dtype)

    def full(a):
        nd = a.ndim
        return pl.BlockSpec(a.shape, lambda n, _nd=nd: (0,) * _nd)

    out_canvas = pl.pallas_call(
        kernel,
        out_shape=jax.ShapeDtypeStruct((N, Cout, L), jnp.float32),
        grid_spec=pltpu.PrefetchScalarGridSpec(
            num_scalar_prefetch=0,
            grid=(N,),
            in_specs=[
                pl.BlockSpec((1, Cin, H, W), lambda n: (n, 0, 0, 0)),
                full(w1), full(b1), full(w2), full(b2), full(mask),
            ],
            out_specs=pl.BlockSpec((1, Cout, L), lambda n: (n, 0, 0)),
            scratch_shapes=[
                pltpu.VMEM((Cin, LBUF), jnp.float32),
                pltpu.VMEM((Cout, LBUF), jnp.float32),
            ],
        ),
        compiler_params=pltpu.CompilerParams(
            dimension_semantics=("parallel",),
            # size to the real tile working set in production; tiny here
            vmem_limit_bytes=32 * 1024 * 1024,
        ),
    )(x_nchw, w1, b1, w2, b2, mask)

    # Crop the zero ring: (N, Cout, (H+2)*(W+2)) -> (N, Cout, H, W).  Contiguous slice,
    # no transpose, no extra layout pass.
    return out_canvas.reshape(N, Cout, H + 2, W + 2)[:, :, 1:H + 1, 1:W + 1]


def reference(x_nchw, params):
    """Pure-JAX reference with identical assumed semantics (NCHW)."""
    dn = lax.conv_dimension_numbers(x_nchw.shape, params["wt"].shape,
                                    ("NCHW", "HWIO", "NCHW"))

    def conv(x, w, b):
        y = lax.conv_general_dilated(x, w, (1, 1), "SAME", dimension_numbers=dn)
        return y + b.reshape(1, -1, 1, 1)

    trunk = jax.nn.relu(conv(x_nchw, params["wt"], params["bt"]))
    r1 = jax.nn.relu(conv(x_nchw, params["wr1"], params["br1"]))
    r2 = conv(r1, params["wr2"], params["br2"])
    sc = (jnp.einsum("nchw,cd->ndhw", x_nchw, params["ws"])
          + params["bs"].reshape(1, -1, 1, 1))
    res = r2 + sc
    return (1.0 + jax.nn.sigmoid(res)) * trunk


if __name__ == "__main__":
    key = jax.random.PRNGKey(0)
    N, Cin, H, W = 2, 4, 16, 16
    Cout = 8
    keys = jax.random.split(key, 9)

    # PyTorch-style NCHW input, consumed directly (no layout transpose).
    x_nchw = jax.random.normal(keys[0], (N, Cin, H, W), jnp.float32)

    params = {
        "wt":  0.2 * jax.random.normal(keys[1], (3, 3, Cin, Cout), jnp.float32),
        "bt":  0.1 * jax.random.normal(keys[2], (Cout,), jnp.float32),
        "wr1": 0.2 * jax.random.normal(keys[3], (3, 3, Cin, Cout), jnp.float32),
        "br1": 0.1 * jax.random.normal(keys[4], (Cout,), jnp.float32),
        "wr2": 0.2 * jax.random.normal(keys[5], (3, 3, Cout, Cout), jnp.float32),
        "br2": 0.1 * jax.random.normal(keys[6], (Cout,), jnp.float32),
        "ws":  0.2 * jax.random.normal(keys[7], (Cin, Cout), jnp.float32),
        "bs":  0.1 * jax.random.normal(keys[8], (Cout,), jnp.float32),
    }

    out = jax.block_until_ready(attention_stage3(x_nchw, params))
    ref = reference(x_nchw, params)
    np.testing.assert_allclose(np.asarray(out), np.asarray(ref), atol=1e-3, rtol=1e-3)
    print("KERNEL_OK")
</pallas_src>

<mosaic_0001>
module attributes {stable_mosaic.version = 11 : i64} {
  func.func @kernel(%arg0: i32, %arg1: memref<1x4x16x16xf32, #tpu.memory_space<vmem>>, %arg2: memref<24x36xf32, #tpu.memory_space<vmem>>, %arg3: memref<24x1xf32, #tpu.memory_space<vmem>>, %arg4: memref<8x72xf32, #tpu.memory_space<vmem>>, %arg5: memref<8x1xf32, #tpu.memory_space<vmem>>, %arg6: memref<1x324xf32, #tpu.memory_space<vmem>>, %arg7: memref<1x8x324xf32, #tpu.memory_space<vmem>>, %arg8: memref<4x362xf32, #tpu.memory_space<vmem>>, %arg9: memref<8x362xf32, #tpu.memory_space<vmem>>) attributes {dimension_semantics = [#tpu.dimension_semantics<parallel>], iteration_bounds = array<i64: 2>, scalar_prefetch = 0 : i64, scratch_operands = 2 : i64, tpu.core_type = #tpu.core_type<tc>, window_params = [{transform_indices = @transform_0, window_bounds = array<i64: 1, 4, 16, 16>}, {pipeline_mode = #tpu.pipeline_mode<synchronous>, transform_indices = @transform_1, window_bounds = array<i64: 24, 36>}, {pipeline_mode = #tpu.pipeline_mode<synchronous>, transform_indices = @transform_2, window_bounds = array<i64: 24, 1>}, {pipeline_mode = #tpu.pipeline_mode<synchronous>, transform_indices = @transform_3, window_bounds = array<i64: 8, 72>}, {pipeline_mode = #tpu.pipeline_mode<synchronous>, transform_indices = @transform_4, window_bounds = array<i64: 8, 1>}, {pipeline_mode = #tpu.pipeline_mode<synchronous>, transform_indices = @transform_5, window_bounds = array<i64: 1, 324>}, {transform_indices = @transform_6, window_bounds = array<i64: 1, 8, 324>}]} {
    %cst = arith.constant 0.000000e+00 : f32
    %0 = vector.broadcast %cst : f32 to vector<4x362xf32>
    %c0 = arith.constant 0 : index
    %c0_0 = arith.constant 0 : index
    %1 = vector.load %arg8[%c0, %c0_0] : memref<4x362xf32, #tpu.memory_space<vmem>>, vector<4x362xf32>
    tpu.vector_store %arg8[%c0, %c0_0], %0 {strides = array<i32>} : memref<4x362xf32, #tpu.memory_space<vmem>>, vector<4x362xf32>,
    %cst_1 = arith.constant 0.000000e+00 : f32
    %2 = vector.broadcast %cst_1 : f32 to vector<8x362xf32>
    %c0_2 = arith.constant 0 : index
    %c0_3 = arith.constant 0 : index
    %3 = vector.load %arg9[%c0_2, %c0_3] : memref<8x362xf32, #tpu.memory_space<vmem>>, vector<8x362xf32>
    tpu.vector_store %arg9[%c0_2, %c0_3], %2 {strides = array<i32>} : memref<8x362xf32, #tpu.memory_space<vmem>>, vector<8x362xf32>,
    %c0_4 = arith.constant 0 : index
    %c0_5 = arith.constant 0 : index
    %c0_6 = arith.constant 0 : index
    %c0_7 = arith.constant 0 : index
    %4 = vector.load %arg1[%c0_4, %c0_5, %c0_6, %c0_7] : memref<1x4x16x16xf32, #tpu.memory_space<vmem>>, vector<1x4x1x16xf32>
    %5 = vector.shape_cast %4 : vector<1x4x1x16xf32> to vector<4x16xf32>
    %c0_8 = arith.constant 0 : index
    %c38 = arith.constant 38 : index
    %6 = vector.load %arg8[%c0_8, %c38] : memref<4x362xf32, #tpu.memory_space<vmem>>, vector<4x16xf32>
    tpu.vector_store %arg8[%c0_8, %c38], %5 {strides = array<i32>} : memref<4x362xf32, #tpu.memory_space<vmem>>, vector<4x16xf32>,
    %c0_9 = arith.constant 0 : index
    %c0_10 = arith.constant 0 : index
    %c1 = arith.constant 1 : index
    %c0_11 = arith.constant 0 : index
    %7 = vector.load %arg1[%c0_9, %c0_10, %c1, %c0_11] : memref<1x4x16x16xf32, #tpu.memory_space<vmem>>, vector<1x4x1x16xf32>
    %8 = vector.shape_cast %7 : vector<1x4x1x16xf32> to vector<4x16xf32>
    %c0_12 = arith.constant 0 : index
    %c56 = arith.constant 56 : index
    %9 = vector.load %arg8[%c0_12, %c56] : memref<4x362xf32, #tpu.memory_space<vmem>>, vector<4x16xf32>
    tpu.vector_store %arg8[%c0_12, %c56], %8 {strides = array<i32>} : memref<4x362xf32, #tpu.memory_space<vmem>>, vector<4x16xf32>,
    %c0_13 = arith.constant 0 : index
    %c0_14 = arith.constant 0 : index
    %c2 = arith.constant 2 : index
    %c0_15 = arith.constant 0 : index
    %10 = vector.load %arg1[%c0_13, %c0_14, %c2, %c0_15] : memref<1x4x16x16xf32, #tpu.memory_space<vmem>>, vector<1x4x1x16xf32>
    %11 = vector.shape_cast %10 : vector<1x4x1x16xf32> to vector<4x16xf32>
    %c0_16 = arith.constant 0 : index
    %c74 = arith.constant 74 : index
    %12 = vector.load %arg8[%c0_16, %c74] : memref<4x362xf32, #tpu.memory_space<vmem>>, vector<4x16xf32>
    tpu.vector_store %arg8[%c0_16, %c74], %11 {strides = array<i32>} : memref<4x362xf32, #tpu.memory_space<vmem>>, vector<4x16xf32>,
    %c0_17 = arith.constant 0 : index
    %c0_18 = arith.constant 0 : index
    %c3 = arith.constant 3 : index
    %c0_19 = arith.constant 0 : index
    %13 = vector.load %arg1[%c0_17, %c0_18, %c3, %c0_19] : memref<1x4x16x16xf32, #tpu.memory_space<vmem>>, vector<1x4x1x16xf32>
    %14 = vector.shape_cast %13 : vector<1x4x1x16xf32> to vector<4x16xf32>
    %c0_20 = arith.constant 0 : index
    %c92 = arith.constant 92 : index
    %15 = vector.load %arg8[%c0_20, %c92] : memref<4x362xf32, #tpu.memory_space<vmem>>, vector<4x16xf32>
    tpu.vector_store %arg8[%c0_20, %c92], %14 {strides = array<i32>} : memref<4x362xf32, #tpu.memory_space<vmem>>, vector<4x16xf32>,
    %c0_21 = arith.constant 0 : index
    %c0_22 = arith.constant 0 : index
    %c4 = arith.constant 4 : index
    %c0_23 = arith.constant 0 : index
    %16 = vector.load %arg1[%c0_21, %c0_22, %c4, %c0_23] : memref<1x4x16x16xf32, #tpu.memory_space<vmem>>, vector<1x4x1x16xf32>
    %17 = vector.shape_cast %16 : vector<1x4x1x16xf32> to vector<4x16xf32>
    %c0_24 = arith.constant 0 : index
    %c110 = arith.constant 110 : index
    %18 = vector.load %arg8[%c0_24, %c110] : memref<4x362xf32, #tpu.memory_space<vmem>>, vector<4x16xf32>
    tpu.vector_store %arg8[%c0_24, %c110], %17 {strides = array<i32>} : memref<4x362xf32, #tpu.memory_space<vmem>>, vector<4x16xf32>,
    %c0_25 = arith.constant 0 : index
    %c0_26 = arith.constant 0 : index
    %c5 = arith.constant 5 : index
    %c0_27 = arith.constant 0 : index
    %19 = vector.load %arg1[%c0_25, %c0_26, %c5, %c0_27] : memref<1x4x16x16xf32, #tpu.memory_space<vmem>>, vector<1x4x1x16xf32>
    %20 = vector.shape_cast %19 : vector<1x4x1x16xf32> to vector<4x16xf32>
    %c0_28 = arith.constant 0 : index
    %c128 = arith.constant 128 : index
    %21 = vector.load %arg8[%c0_28, %c128] : memref<4x362xf32, #tpu.memory_space<vmem>>, vector<4x16xf32>
    tpu.vector_store %arg8[%c0_28, %c128], %20 {strides = array<i32>} : memref<4x362xf32, #tpu.memory_space<vmem>>, vector<4x16xf32>,
    %c0_29 = arith.constant 0 : index
    %c0_30 = arith.constant 0 : index
    %c6 = arith.constant 6 : index
    %c0_31 = arith.constant 0 : index
    %22 = vector.load %arg1[%c0_29, %c0_30, %c6, %c0_31] : memref<1x4x16x16xf32, #tpu.memory_space<vmem>>, vector<1x4x1x16xf32>
    %23 = vector.shape_cast %22 : vector<1x4x1x16xf32> to vector<4x16xf32>
    %c0_32 = arith.constant 0 : index
    %c146 = arith.constant 146 : index
    %24 = vector.load %arg8[%c0_32, %c146] : memref<4x362xf32, #tpu.memory_space<vmem>>, vector<4x16xf32>
    tpu.vector_store %arg8[%c0_32, %c146], %23 {strides = array<i32>} : memref<4x362xf32, #tpu.memory_space<vmem>>, vector<4x16xf32>,
    %c0_33 = arith.constant 0 : index
    %c0_34 = arith.constant 0 : index
    %c7 = arith.constant 7 : index
    %c0_35 = arith.constant 0 : index
    %25 = vector.load %arg1[%c0_33, %c0_34, %c7, %c0_35] : memref<1x4x16x16xf32, #tpu.memory_space<vmem>>, vector<1x4x1x16xf32>
    %26 = vector.shape_cast %25 : vector<1x4x1x16xf32> to vector<4x16xf32>
    %c0_36 = arith.constant 0 : index
    %c164 = arith.constant 164 : index
    %27 = vector.load %arg8[%c0_36, %c164] : memref<4x362xf32, #tpu.memory_space<vmem>>, vector<4x16xf32>
    tpu.vector_store %arg8[%c0_36, %c164], %26 {strides = array<i32>} : memref<4x362xf32, #tpu.memory_space<vmem>>, vector<4x16xf32>,
    %c0_37 = arith.constant 0 : index
    %c0_38 = arith.constant 0 : index
    %c8 = arith.constant 8 : index
    %c0_39 = arith.constant 0 : index
    %28 = vector.load %arg1[%c0_37, %c0_38, %c8, %c0_39] : memref<1x4x16x16xf32, #tpu.memory_space<vmem>>, vector<1x4x1x16xf32>
    %29 = vector.shape_cast %28 : vector<1x4x1x16xf32> to vector<4x16xf32>
    %c0_40 = arith.constant 0 : index
    %c182 = arith.constant 182 : index
    %30 = vector.load %arg8[%c0_40, %c182] : memref<4x362xf32, #tpu.memory_space<vmem>>, vector<4x16xf32>
    tpu.vector_store %arg8[%c0_40, %c182], %29 {strides = array<i32>} : memref<4x362xf32, #tpu.memory_space<vmem>>, vector<4x16xf32>,
    %c0_41 = arith.constant 0 : index
    %c0_42 = arith.constant 0 : index
    %c9 = arith.constant 9 : index
    %c0_43 = arith.constant 0 : index
    %31 = vector.load %arg1[%c0_41, %c0_42, %c9, %c0_43] : memref<1x4x16x16xf32, #tpu.memory_space<vmem>>, vector<1x4x1x16xf32>
    %32 = vector.shape_cast %31 : vector<1x4x1x16xf32> to vector<4x16xf32>
    %c0_44 = arith.constant 0 : index
    %c200 = arith.constant 200 : index
    %33 = vector.load %arg8[%c0_44, %c200] : memref<4x362xf32, #tpu.memory_space<vmem>>, vector<4x16xf32>
    tpu.vector_store %arg8[%c0_44, %c200], %32 {strides = array<i32>} : memref<4x362xf32, #tpu.memory_space<vmem>>, vector<4x16xf32>,
    %c0_45 = arith.constant 0 : index
    %c0_46 = arith.constant 0 : index
    %c10 = arith.constant 10 : index
    %c0_47 = arith.constant 0 : index
    %34 = vector.load %arg1[%c0_45, %c0_46, %c10, %c0_47] : memref<1x4x16x16xf32, #tpu.memory_space<vmem>>, vector<1x4x1x16xf32>
    %35 = vector.shape_cast %34 : vector<1x4x1x16xf32> to vector<4x16xf32>
    %c0_48 = arith.constant 0 : index
    %c218 = arith.constant 218 : index
    %36 = vector.load %arg8[%c0_48, %c218] : memref<4x362xf32, #tpu.memory_space<vmem>>, vector<4x16xf32>
    tpu.vector_store %arg8[%c0_48, %c218], %35 {strides = array<i32>} : memref<4x362xf32, #tpu.memory_space<vmem>>, vector<4x16xf32>,
    %c0_49 = arith.constant 0 : index
    %c0_50 = arith.constant 0 : index
    %c11 = arith.constant 11 : index
    %c0_51 = arith.constant 0 : index
    %37 = vector.load %arg1[%c0_49, %c0_50, %c11, %c0_51] : memref<1x4x16x16xf32, #tpu.memory_space<vmem>>, vector<1x4x1x16xf32>
    %38 = vector.shape_cast %37 : vector<1x4x1x16xf32> to vector<4x16xf32>
    %c0_52 = arith.constant 0 : index
    %c236 = arith.constant 236 : index
    %39 = vector.load %arg8[%c0_52, %c236] : memref<4x362xf32, #tpu.memory_space<vmem>>, vector<4x16xf32>
    tpu.vector_store %arg8[%c0_52, %c236], %38 {strides = array<i32>} : memref<4x362xf32, #tpu.memory_space<vmem>>, vector<4x16xf32>,
    %c0_53 = arith.constant 0 : index
    %c0_54 = arith.constant 0 : index
    %c12 = arith.constant 12 : index
    %c0_55 = arith.constant 0 : index
    %40 = vector.load %arg1[%c0_53, %c0_54, %c12, %c0_55] : memref<1x4x16x16xf32, #tpu.memory_space<vmem>>, vector<1x4x1x16xf32>
    %41 = vector.shape_cast %40 : vector<1x4x1x16xf32> to vector<4x16xf32>
    %c0_56 = arith.constant 0 : index
    %c254 = arith.constant 254 : index
    %42 = vector.load %arg8[%c0_56, %c254] : memref<4x362xf32, #tpu.memory_space<vmem>>, vector<4x16xf32>
    tpu.vector_store %arg8[%c0_56, %c254], %41 {strides = array<i32>} : memref<4x362xf32, #tpu.memory_space<vmem>>, vector<4x16xf32>,
    %c0_57 = arith.constant 0 : index
    %c0_58 = arith.constant 0 : index
    %c13 = arith.constant 13 : index
    %c0_59 = arith.constant 0 : index
    %43 = vector.load %arg1[%c0_57, %c0_58, %c13, %c0_59] : memref<1x4x16x16xf32, #tpu.memory_space<vmem>>, vector<1x4x1x16xf32>
    %44 = vector.shape_cast %43 : vector<1x4x1x16xf32> to vector<4x16xf32>
    %c0_60 = arith.constant 0 : index
    %c272 = arith.constant 272 : index
    %45 = vector.load %arg8[%c0_60, %c272] : memref<4x362xf32, #tpu.memory_space<vmem>>, vector<4x16xf32>
    tpu.vector_store %arg8[%c0_60, %c272], %44 {strides = array<i32>} : memref<4x362xf32, #tpu.memory_space<vmem>>, vector<4x16xf32>,
    %c0_61 = arith.constant 0 : index
    %c0_62 = arith.constant 0 : index
    %c14 = arith.constant 14 : index
    %c0_63 = arith.constant 0 : index
    %46 = vector.load %arg1[%c0_61, %c0_62, %c14, %c0_63] : memref<1x4x16x16xf32, #tpu.memory_space<vmem>>, vector<1x4x1x16xf32>
    %47 = vector.shape_cast %46 : vector<1x4x1x16xf32> to vector<4x16xf32>
    %c0_64 = arith.constant 0 : index
    %c290 = arith.constant 290 : index
    %48 = vector.load %arg8[%c0_64, %c290] : memref<4x362xf32, #tpu.memory_space<vmem>>, vector<4x16xf32>
    tpu.vector_store %arg8[%c0_64, %c290], %47 {strides = array<i32>} : memref<4x362xf32, #tpu.memory_space<vmem>>, vector<4x16xf32>,
    %c0_65 = arith.constant 0 : index
    %c0_66 = arith.constant 0 : index
    %c15 = arith.constant 15 : index
    %c0_67 = arith.constant 0 : index
    %49 = vector.load %arg1[%c0_65, %c0_66, %c15, %c0_67] : memref<1x4x16x16xf32, #tpu.memory_space<vmem>>, vector<1x4x1x16xf32>
    %50 = vector.shape_cast %49 : vector<1x4x1x16xf32> to vector<4x16xf32>
    %c0_68 = arith.constant 0 : index
    %c308 = arith.constant 308 : index
    %51 = vector.load %arg8[%c0_68, %c308] : memref<4x362xf32, #tpu.memory_space<vmem>>, vector<4x16xf32>
    tpu.vector_store %arg8[%c0_68, %c308], %50 {strides = array<i32>} : memref<4x362xf32, #tpu.memory_space<vmem>>, vector<4x16xf32>,
    %c0_69 = arith.constant 0 : index
    %c0_70 = arith.constant 0 : index
    %52 = vector.load %arg8[%c0_69, %c0_70] : memref<4x362xf32, #tpu.memory_space<vmem>>, vector<4x324xf32>
    %c0_71 = arith.constant 0 : index
    %c1_72 = arith.constant 1 : index
    %53 = vector.load %arg8[%c0_71, %c1_72] : memref<4x362xf32, #tpu.memory_space<vmem>>, vector<4x324xf32>
    %c0_73 = arith.constant 0 : index
    %c2_74 = arith.constant 2 : index
    %54 = vector.load %arg8[%c0_73, %c2_74] : memref<4x362xf32, #tpu.memory_space<vmem>>, vector<4x324xf32>
    %c0_75 = arith.constant 0 : index
    %c18 = arith.constant 18 : index
    %55 = vector.load %arg8[%c0_75, %c18] : memref<4x362xf32, #tpu.memory_space<vmem>>, vector<4x324xf32>
    %c0_76 = arith.constant 0 : index
    %c19 = arith.constant 19 : index
    %56 = vector.load %arg8[%c0_76, %c19] : memref<4x362xf32, #tpu.memory_space<vmem>>, vector<4x324xf32>
    %c0_77 = arith.constant 0 : index
    %c20 = arith.constant 20 : index
    %57 = vector.load %arg8[%c0_77, %c20] : memref<4x362xf32, #tpu.memory_space<vmem>>, vector<4x324xf32>
    %c0_78 = arith.constant 0 : index
    %c36 = arith.constant 36 : index
    %58 = vector.load %arg8[%c0_78, %c36] : memref<4x362xf32, #tpu.memory_space<vmem>>, vector<4x324xf32>
    %c0_79 = arith.constant 0 : index
    %c37 = arith.constant 37 : index
    %59 = vector.load %arg8[%c0_79, %c37] : memref<4x362xf32, #tpu.memory_space<vmem>>, vector<4x324xf32>
    %c0_80 = arith.constant 0 : index
    %c38_81 = arith.constant 38 : index
    %60 = vector.load %arg8[%c0_80, %c38_81] : memref<4x362xf32, #tpu.memory_space<vmem>>, vector<4x324xf32>
    %61 = tpu.concatenate %52, %53, %54, %55, %56, %57, %58, %59, %60 in 0 : vector<4x324xf32>, vector<4x324xf32>, vector<4x324xf32>, vector<4x324xf32>, vector<4x324xf32>, vector<4x324xf32>, vector<4x324xf32>, vector<4x324xf32>, vector<4x324xf32> -> vector<36x324xf32>
    %c0_82 = arith.constant 0 : index
    %c0_83 = arith.constant 0 : index
    %62 = vector.load %arg2[%c0_82, %c0_83] : memref<24x36xf32, #tpu.memory_space<vmem>>, vector<24x36xf32>
    %cst_84 = arith.constant dense<0.000000e+00> : vector<24x324xf32>
    %63 = tpu.matmul %62, %61, %cst_84 {dimension_numbers = #tpu.dot_dimension_numbers<[1], [0], [0], [1], [0, 0, 1, 1], [], []>} : vector<24x36xf32>, vector<36x324xf32>, vector<24x324xf32> -> vector<24x324xf32>
    %c0_85 = arith.constant 0 : index
    %c0_86 = arith.constant 0 : index
    %64 = vector.load %arg3[%c0_85, %c0_86] : memref<24x1xf32, #tpu.memory_space<vmem>>, vector<24x1xf32>
    %65 = vector.broadcast %64 : vector<24x1xf32> to vector<24x324xf32>
    %66 = arith.addf %63, %65 : vector<24x324xf32>
    %67 = vector.extract_strided_slice %66 {offsets = [0, 0], sizes = [8, 324], strides = [1, 1]} : vector<24x324xf32> to vector<8x324xf32>
    %cst_87 = arith.constant 0.000000e+00 : f32
    %68 = vector.broadcast %cst_87 : f32 to vector<8x324xf32>
    %69 = arith.maximumf %67, %68 : vector<8x324xf32>
    %70 = vector.extract_strided_slice %66 {offsets = [8, 0], sizes = [8, 324], strides = [1, 1]} : vector<24x324xf32> to vector<8x324xf32>
    %cst_88 = arith.constant 0.000000e+00 : f32
    %71 = vector.broadcast %cst_88 : f32 to vector<8x324xf32>
    %72 = arith.maximumf %70, %71 : vector<8x324xf32>
    %c0_89 = arith.constant 0 : index
    %c0_90 = arith.constant 0 : index
    %73 = vector.load %arg6[%c0_89, %c0_90] : memref<1x324xf32, #tpu.memory_space<vmem>>, vector<1x324xf32>
    %74 = vector.broadcast %73 : vector<1x324xf32> to vector<8x324xf32>
    %75 = arith.mulf %72, %74 : vector<8x324xf32>
    %76 = vector.extract_strided_slice %66 {offsets = [16, 0], sizes = [8, 324], strides = [1, 1]} : vector<24x324xf32> to vector<8x324xf32>
    %c0_91 = arith.constant 0 : index
    %c19_92 = arith.constant 19 : index
    %77 = vector.load %arg9[%c0_91, %c19_92] : memref<8x362xf32, #tpu.memory_space<vmem>>, vector<8x324xf32>
    tpu.vector_store %arg9[%c0_91, %c19_92], %75 {strides = array<i32>} : memref<8x362xf32, #tpu.memory_space<vmem>>, vector<8x324xf32>,
    %c0_93 = arith.constant 0 : index
    %c0_94 = arith.constant 0 : index
    %78 = vector.load %arg9[%c0_93, %c0_94] : memref<8x362xf32, #tpu.memory_space<vmem>>, vector<8x324xf32>
    %c0_95 = arith.constant 0 : index
    %c1_96 = arith.constant 1 : index
    %79 = vector.load %arg9[%c0_95, %c1_96] : memref<8x362xf32, #tpu.memory_space<vmem>>, vector<8x324xf32>
    %c0_97 = arith.constant 0 : index
    %c2_98 = arith.constant 2 : index
    %80 = vector.load %arg9[%c0_97, %c2_98] : memref<8x362xf32, #tpu.memory_space<vmem>>, vector<8x324xf32>
    %c0_99 = arith.constant 0 : index
    %c18_100 = arith.constant 18 : index
    %81 = vector.load %arg9[%c0_99, %c18_100] : memref<8x362xf32, #tpu.memory_space<vmem>>, vector<8x324xf32>
    %c0_101 = arith.constant 0 : index
    %c19_102 = arith.constant 19 : index
    %82 = vector.load %arg9[%c0_101, %c19_102] : memref<8x362xf32, #tpu.memory_space<vmem>>, vector<8x324xf32>
    %c0_103 = arith.constant 0 : index
    %c20_104 = arith.constant 20 : index
    %83 = vector.load %arg9[%c0_103, %c20_104] : memref<8x362xf32, #tpu.memory_space<vmem>>, vector<8x324xf32>
    %c0_105 = arith.constant 0 : index
    %c36_106 = arith.constant 36 : index
    %84 = vector.load %arg9[%c0_105, %c36_106] : memref<8x362xf32, #tpu.memory_space<vmem>>, vector<8x324xf32>
    %c0_107 = arith.constant 0 : index
    %c37_108 = arith.constant 37 : index
    %85 = vector.load %arg9[%c0_107, %c37_108] : memref<8x362xf32, #tpu.memory_space<vmem>>, vector<8x324xf32>
    %c0_109 = arith.constant 0 : index
    %c38_110 = arith.constant 38 : index
    %86 = vector.load %arg9[%c0_109, %c38_110] : memref<8x362xf32, #tpu.memory_space<vmem>>, vector<8x324xf32>
    %87 = tpu.concatenate %78, %79, %80, %81, %82, %83, %84, %85, %86 in 0 : vector<8x324xf32>, vector<8x324xf32>, vector<8x324xf32>, vector<8x324xf32>, vector<8x324xf32>, vector<8x324xf32>, vector<8x324xf32>, vector<8x324xf32>, vector<8x324xf32> -> vector<72x324xf32>
    %c0_111 = arith.constant 0 : index
    %c0_112 = arith.constant 0 : index
    %88 = vector.load %arg4[%c0_111, %c0_112] : memref<8x72xf32, #tpu.memory_space<vmem>>, vector<8x72xf32>
    %cst_113 = arith.constant dense<0.000000e+00> : vector<8x324xf32>
    %89 = tpu.matmul %88, %87, %cst_113 {dimension_numbers = #tpu.dot_dimension_numbers<[1], [0], [0], [1], [0, 0, 1, 1], [], []>} : vector<8x72xf32>, vector<72x324xf32>, vector<8x324xf32> -> vector<8x324xf32>
    %c0_114 = arith.constant 0 : index
    %c0_115 = arith.constant 0 : index
    %90 = vector.load %arg5[%c0_114, %c0_115] : memref<8x1xf32, #tpu.memory_space<vmem>>, vector<8x1xf32>
    %91 = vector.broadcast %90 : vector<8x1xf32> to vector<8x324xf32>
    %92 = arith.addf %89, %91 : vector<8x324xf32>
    %93 = arith.addf %92, %76 : vector<8x324xf32>
    %94 = arith.negf %93 : vector<8x324xf32>
    %95 = math.exp %94 : vector<8x324xf32>
    %cst_116 = arith.constant 1.000000e+00 : f32
    %96 = vector.broadcast %cst_116 : f32 to vector<8x324xf32>
    %97 = arith.addf %96, %95 : vector<8x324xf32>
    %98 = arith.divf %96, %97 : vector<8x324xf32>
    %cst_117 = arith.constant 1.000000e+00 : f32
    %99 = vector.broadcast %cst_117 : f32 to vector<8x324xf32>
    %100 = arith.addf %99, %98 : vector<8x324xf32>
    %101 = arith.mulf %100, %69 : vector<8x324xf32>
    %102 = vector.shape_cast %101 : vector<8x324xf32> to vector<1x8x324xf32>
    %c0_118 = arith.constant 0 : index
    %c0_119 = arith.constant 0 : index
    %c0_120 = arith.constant 0 : index
    %103 = vector.load %arg7[%c0_118, %c0_119, %c0_120] : memref<1x8x324xf32, #tpu.memory_space<vmem>>, vector<1x8x324xf32>
    tpu.vector_store %arg7[%c0_118, %c0_119, %c0_120], %102 {strides = array<i32>} : memref<1x8x324xf32, #tpu.memory_space<vmem>>, vector<1x8x324xf32>,
    return
  }
  func.func @transform_0(%arg0: i32) -> (i32, i32, i32, i32) {
    %c0_i32 = arith.constant 0 : i32
    %c0_i32_0 = arith.constant 0 : i32
    %c0_i32_1 = arith.constant 0 : i32
    %c0_i32_2 = arith.constant 0 : i32
    return %arg0, %c0_i32, %c0_i32_0, %c0_i32_1 : i32, i32, i32, i32
  }
  func.func @transform_1(%arg0: i32) -> (i32, i32) {
    %c0_i32 = arith.constant 0 : i32
    %c0_i32_0 = arith.constant 0 : i32
    %c0_i32_1 = arith.constant 0 : i32
    return %c0_i32, %c0_i32_0 : i32, i32
  }
  func.func @transform_2(%arg0: i32) -> (i32, i32) {
    %c0_i32 = arith.constant 0 : i32
    %c0_i32_0 = arith.constant 0 : i32
    %c0_i32_1 = arith.constant 0 : i32
    return %c0_i32, %c0_i32_0 : i32, i32
  }
  func.func @transform_3(%arg0: i32) -> (i32, i32) {
    %c0_i32 = arith.constant 0 : i32
    %c0_i32_0 = arith.constant 0 : i32
    %c0_i32_1 = arith.constant 0 : i32
    return %c0_i32, %c0_i32_0 : i32, i32
  }
  func.func @transform_4(%arg0: i32) -> (i32, i32) {
    %c0_i32 = arith.constant 0 : i32
    %c0_i32_0 = arith.constant 0 : i32
    %c0_i32_1 = arith.constant 0 : i32
    return %c0_i32, %c0_i32_0 : i32, i32
  }
  func.func @transform_5(%arg0: i32) -> (i32, i32) {
    %c0_i32 = arith.constant 0 : i32
    %c0_i32_0 = arith.constant 0 : i32
    %c0_i32_1 = arith.constant 0 : i32
    return %c0_i32, %c0_i32_0 : i32, i32
  }
  func.func @transform_6(%arg0: i32) -> (i32, i32, i32) {
    %c0_i32 = arith.constant 0 : i32
    %c0_i32_0 = arith.constant 0 : i32
    %c0_i32_1 = arith.constant 0 : i32
    return %arg0, %c0_i32, %c0_i32_0 : i32, i32, i32
  }
}

</mosaic_0001>

<bundles_post_ra>
// kernel: tpu_custom_call.1
= control target key start
LH: loop header
LB: loop body
LE: loop exit
PB: predicated region body
PF: predicated region fallthrough
CT: control target
= control target key end

     0   :  { %11 = vsyncpa [#allocation5], 0  ;;  %s2315_s0 = inlined_call_operand.hbm [shape: f32[2,4,16,16], index: 0, kind: input, shape index: {}]   ;;  %s2316_s1 = inlined_call_operand.vmem [shape: f32[24,36], index: 1, kind: input, shape index: {}]   ;;  %s2317_s2 = inlined_call_operand.vmem [shape: f32[24,1], index: 2, kind: input, shape index: {}]   ;;  %s2318_s3 = inlined_call_operand.vmem [shape: f32[8,72], index: 3, kind: input, shape index: {}]   ;;  %s2319_s4 = inlined_call_operand.vmem [shape: f32[8,1], index: 4, kind: input, shape index: {}]   ;;  %s2320_s5 = inlined_call_operand.vmem [shape: f32[1,324], index: 5, kind: input, shape index: {}]   ;;  %s2321_s6 = inlined_call_operand.hbm [shape: f32[2,8,324], index: 6, kind: output, shape index: {}]  }
   0x1   :  { %13 = vsyncpa [#allocation5 + $0x1], 0 }
   0x2   :  { %14 = vsyncpa [#allocation6], 0 }
   0x3   :  { %16 = vsyncpa [#allocation6 + $0x1], 0  ;;  %s1815_s21 = smov 0   ;;  %s1817_s22 = smov 0  }
   0x4   :  { %s1819_s23 = smov 0   ;;  %s1821_s24 = smov 0  }
   0x5 LB: > { %s1836_s25 = sadd.s32 4294967295, %s1751_s24   ;;  %s1359_s26 = sadd.s32 4294967294, %s1751_s24   ;;  %s1751_s24 = sphi %s1821_s24, %s2334_s24   ;;  %s1747_s23 = sphi %s1819_s23, %s2333_s23   ;;  %s1743_s22 = sphi %s1817_s22, %s2332_s22   ;;  %s1739_s21 = sphi %s1815_s21, %s2331_s21  }
   0x6   : > { %s1840_s27 = sadd.s32 1, %s1751_s24   ;;  %s29_s28 = sadd.s32 1, %s1747_s23 }
   0x7   : > { %s26_s29 = ssub.s32 %s1751_s24, %s1840_s27  ;;  %p36_p0 = scmp.ne.s32.totalorder %s1747_s23, %s1743_s22 }
   0x8   : > { %p27_p1 = scmp.eq.s32.totalorder %s26_s29, 0  ;;  %p37_p2 = scmp.eq.s32.totalorder %s1751_s24, 0 }
   0x9   : > { %p42_p3 = scmp.ne.s32.totalorder %s1743_s22, %s1739_s21  ;;  %p43_p4 = scmp.eq.s32.totalorder %s1836_s25, 0 }
   0xa   : > { %s1852_s30 = scalar_select %p27_p1, %s1747_s23, %s29_s28  }
   0xb   : > { %p1854_p5 = por %p37_p2, %p36_p0  ;;  %p1858_p6 = por %p43_p4, %p42_p3 }
   0xc   : > { %p171_p7 = scmp.eq.s32.totalorder %s1836_s25, 1  ;;  %p177_p8 = scmp.eq.s32.totalorder %s1359_s26, 1 }
   0xd   : > { %p1509_p10 = scmp.lt.s32.totalorder %s1751_s24, 2  ;;  %s212_s11 = sand.u32 1, %s1747_s23  }
   0xe   : > { %p1865_p11 = por %p171_p7, %p36_p0  ;;  %p1869_p12 = por %p177_p8, %p42_p3 }
   0xf   : > { %s1384_s12 = sshll.u32 %s1751_s24, 10  ;;  %s1362_s13 = sshll.u32 %s212_s11, 6 }
  0x10   : > { %s2325_s9 = scalar_select %p1865_p11, 1, 0 }
  0x11   : > { %s2326_s10 = scalar_select %p1869_p12, 1, 0 }
  0x12   : > { %s1878_s16 = scalar_lea.hbm %s2315_s0, %s1384_s12  ;;  %s216_s17 = scalar_lea.vmem [#allocation4], %s1362_s13 }
  0x13   : > { %s223_s18 = sshll.u32 %s216_s17, 4  ;;  %p1882_p13 = pnand %p1509_p10, %p1854_p5  ;;  %s1886_s18 = int_to_ptr.vmem [resolvable:$true] %s223_s18 }
  0x14   : > { %s1888_s20 = scalar_lea.sflag [#allocation5], %s212_s11  ;;  %s1655_s26 = scalar_lea.hbm %s1878_s16, 1024 }
  0x15   : > { %p1656_p0 = scmp.ne.s32.totalorder %s1878_s16, %s1655_s26  ;;  %p1657_p1 = pneg %p1882_p13 }
  0x16   : > { %s1660_s7 = scalar_lea.hbm %s2315_s0, 2048  ;;  %p1661_p4 = scmp.lt.u32.totalorder %s1878_s16, %s2315_s0 }
  0x17   : > { %p1658_p2 = pnand %p1657_p1, %p1656_p0  ;;  %p1662_p5 = scmp.lt.u32.totalorder %s1660_s7, %s1655_s26 }
  0x18   : > { %p1664_p8 = scmp.lt.u32.totalorder %s1655_s26, %s1878_s16 }
  0x19   : > { %p1659_p3 = pneg %p1658_p2  ;;  %p1663_p7 = por %p1662_p5, %p1661_p4 }
  0x1b   : > { %p1665_p10 = por %p1664_p8, %p1663_p7 }
  0x1d   : > { %p1666_p9 = pnand %p1665_p10, %p1659_p3 }
  0x1f   : > { %1669 = shalt.err (!%p1666_p9)
}
  0x20   : > { %s1670_s11 = scalar_lea.vmem %s1886_s18, 1024  ;;  %s1753_s14 = smov [#allocation4]  }
  0x21   : > { %p1671_p0 = scmp.ne.s32.totalorder %s1886_s18, %s1670_s11  ;;  %s1675_s15 = sshll.u32 %s1753_s14, 4  ;;  %s1676_s15 = int_to_ptr.vmem [resolvable:$false] %s1675_s15 }
  0x22   : > { %s1677_s17 = scalar_lea.vmem %s1676_s15, 2048  ;;  %p1678_p11 = scmp.lt.s32.totalorder %s1886_s18, %s1676_s15 }
  0x23   : > { %p1673_p2 = pnand %p1671_p0, %p1657_p1  ;;  %p1679_p4 = scmp.lt.s32.totalorder %s1677_s17, %s1670_s11 }
  0x25   : > { %p1674_p12 = pneg %p1673_p2  ;;  %p1680_p5 = por %p1679_p4, %p1678_p11 }
  0x27   : > { %p1681_p7 = pnand %p1680_p5, %p1674_p12 }
  0x29   : > { %1684 = shalt.err (!%p1681_p7)
}
  0x2a   : > { %s1754_s26 = smov 128   ;;  %s1755_s28 = smov 8  }
  0x2b   : > { %1504 = dma.hbm_to_vmem [thread:$0]  (!%p1882_p13), %s1878_s16, 1024, %s1886_s18, %s1888_s20, %s1754_s26, %s1754_s26, %s1755_s28  }
  0x2c   : > { %p1365_p9 = scmp.ge.s32.totalorder %s1751_s24, 1  ;;  %p231_p1 = scmp.lt.s32.totalorder %s1751_s24, 3 }
  0x2e   : > { %p232_p3 = pnand %p1365_p9, %p231_p1 }
  0x2f   : > { %s1919_s29 = sand.u32 (!%p232_p3), 1, %s1743_s22  }
  0x30   : > { %235 = sbr.rel (%p232_p3) target bundleno = 1122 (0x462), region = 44  ;;  %s1366_s7 = sshll.u32 (!%p232_p3), %s1919_s29, 6 }
  0x31   : > { %s238_s12 = scalar_lea.sflag (!%p232_p3), [#allocation5], %s1919_s29  ;;  %s1923_s13 = scalar_lea.vmem (!%p232_p3), [#allocation4], %s1366_s7 }
  0x37   : > { %1730 = dma.done.wait (%p1858_p6), %s238_s12, 1024  }
  0x38   : > { %1732 = vsyncadd (%p1858_p6), %s238_s12, 4294966272  ;;  %v1756_v0 = vmov 0.0   ;;  %vm286_vm0 = vcmask 1041409   ;;  %vm288_vm1 = vcmask 1045509   ;;  %vm291_vm2 = vcmask 1042434   ;;  %s1757_s8 = smov 54  }
  0x39   : > { %270 = vst [vmem:[#allocation2] sm:$0xff] %v1756_v0  ;;  %273 = vst [vmem:[#allocation3] sm:$0xff] %v1756_v0  ;;  %852 = vmatprep.mubr.f32.mxu0 %v1756_v0  ;;  %vm293_vm3 = vcmask 1046534   ;;  %v457_v1 = vld [vmem:[%s1923_s13 + $0x8] sm:$0x1]  ;;  %vm296_vm4 = vcmask 1043459  }
  0x3a   : > { %v458_v2 = vld [vmem:[%s1923_s13 + $0x18] sm:$0x1]  ;;  %v459_v3 = vld [vmem:[%s1923_s13 + $0x28] sm:$0x1]  ;;  %v413_v7 = vld [vmem:[%s1923_s13 + $0x6] sm:$0x1] }
  0x3b   : > { %v460_v4 = vld [vmem:[%s1923_s13 + $0x38] sm:$0x1]  ;;  %v465_v5 = vrot.slane %v458_v2, 7  ;;  %v468_v6 = vrot.slane %v459_v3, 6  ;;  %v414_v9 = vld [vmem:[%s1923_s13 + $0x16] sm:$0x1] }
  0x3c   : > { %v471_v8 = vrot.slane %v460_v4, 5  ;;  %v415_v10 = vld [vmem:[%s1923_s13 + $0x26] sm:$0x1]  ;;  %v416_v12 = vld [vmem:[%s1923_s13 + $0x36] sm:$0x1]  ;;  %v421_v13 = vrot.slane %v414_v9, 7 }
  0x3d   : > { %v466_v11 = vsel %vm286_vm0, %v465_v5, %v457_v1  ;;  %v424_v14 = vrot.slane %v415_v10, 6  ;;  %v479_v15 = vld [vmem:[%s1923_s13 + $0x9] sm:$0x1]  ;;  %vm298_vm5 = vcmask 1047559   ;;  %v427_v17 = vrot.slane %v416_v12, 5  ;;  %s1758_s16 = smov 18  }
  0x3e   : > { %v467_v16 = vsel %vm288_vm1, %v465_v5, %v466_v11  ;;  %v480_v18 = vld [vmem:[%s1923_s13 + $0x19] sm:$0x1]  ;;  %v481_v19 = vld [vmem:[%s1923_s13 + $0x29] sm:$0x1]  ;;  %v422_v21 = vsel %vm286_vm0, %v421_v13, %v413_v7  ;;  %v435_v25 = vld [vmem:[%s1923_s13 + $0x7] sm:$0x1] }
  0x3f   : > { %v469_v20 = vsel %vm291_vm2, %v468_v6, %v467_v16  ;;  %v482_v22 = vld [vmem:[%s1923_s13 + $0x39] sm:$0x1]  ;;  %v487_v23 = vrot.slane %v480_v18, 7  ;;  %v490_v24 = vrot.slane %v481_v19, 6  ;;  %v423_v27 = vsel %vm288_vm1, %v421_v13, %v422_v21  ;;  %v436_v29 = vld [vmem:[%s1923_s13 + $0x17] sm:$0x1] }
  0x40   : > { %v470_v26 = vsel %vm293_vm3, %v468_v6, %v469_v20  ;;  %v493_v28 = vrot.slane %v482_v22, 5  ;;  %v437_v30 = vld [vmem:[%s1923_s13 + $0x27] sm:$0x1]  ;;  %v425_v32 = vsel %vm291_vm2, %v424_v14, %v423_v27  ;;  %v438_v34 = vld [vmem:[%s1923_s13 + $0x37] sm:$0x1]  ;;  %v443_v35 = vrot.slane %v436_v29, 7 }
  0x41   : > { %v472_v31 = vsel %vm296_vm4, %v471_v8, %v470_v26  ;;  %v488_v33 = vsel %vm286_vm0, %v487_v23, %v479_v15  ;;  %v426_v37 = vsel %vm293_vm3, %v424_v14, %v425_v32  ;;  %v446_v39 = vrot.slane %v437_v30, 6  ;;  %v502_v40 = vld [vmem:[%s1923_s13 + $0x1a] sm:$0x1]  ;;  %v503_v41 = vld [vmem:[%s1923_s13 + $0x2a] sm:$0x1]  ;;  %s1759_s18 = smov 72  }
  0x42   : > { %v473_v36 = vsel %vm298_vm5, %v471_v8, %v472_v31  ;;  %v489_v38 = vsel %vm288_vm1, %v487_v23, %v488_v33  ;;  %v428_v42 = vsel %vm296_vm4, %v427_v17, %v426_v37  ;;  %v444_v44 = vsel %vm286_vm0, %v443_v35, %v435_v25  ;;  %v501_v46 = vld [vmem:[%s1923_s13 + $0xa] sm:$0x1]  ;;  %v504_v47 = vld [vmem:[%s1923_s13 + $0x3a] sm:$0x1]  ;;  %v546_v52 = vld [vmem:[%s1923_s13 + $0x1c] sm:$0x1] }
  0x43   : > { %474 = vrot.lane.b32.xlu1 %v473_v36, %s1757_s8  ;;  %v491_v43 = vsel %vm291_vm2, %v490_v24, %v489_v38  ;;  %v449_v45 = vrot.slane %v438_v34, 5  ;;  %v429_v48 = vsel %vm298_vm5, %v427_v17, %v428_v42  ;;  %v445_v50 = vsel %vm288_vm1, %v443_v35, %v444_v44  ;;  %v547_v53 = vld [vmem:[%s1923_s13 + $0x2c] sm:$0x1]  ;;  %v548_v59 = vld [vmem:[%s1923_s13 + $0x3c] sm:$0x1]  ;;  %s1760_s19 = smov 36  }
  0x44   : > { %v492_v49 = vsel %vm293_vm3, %v490_v24, %v491_v43  ;;  %v509_v51 = vrot.slane %v502_v40, 7  ;;  %430 = vrot.lane.b32.xlu0 %v429_v48, %s1758_s16  ;;  %v447_v55 = vsel %vm291_vm2, %v446_v39, %v445_v50  ;;  %v512_v56 = vrot.slane %v503_v41, 6  ;;  %v545_v58 = vld [vmem:[%s1923_s13 + $0xc] sm:$0x1]  ;;  %v524_v1 = vld [vmem:[%s1923_s13 + $0x1b] sm:$0x1] }
  0x45   : > { %v494_v54 = vsel %vm296_vm4, %v493_v28, %v492_v49  ;;  %v515_v57 = vrot.slane %v504_v47, 5  ;;  %v448_v61 = vsel %vm293_vm3, %v446_v39, %v447_v55  ;;  %v553_v63 = vrot.slane %v546_v52, 7  ;;  %v525_v2 = vld [vmem:[%s1923_s13 + $0x2b] sm:$0x1]  ;;  %v526_v8 = vld [vmem:[%s1923_s13 + $0x3b] sm:$0x1] }
  0x46   : > { %v495_v60 = vsel %vm298_vm5, %v493_v28, %v494_v54  ;;  %v510_v62 = vsel %vm286_vm0, %v509_v51, %v501_v46  ;;  %v450_v3 = vsel %vm296_vm4, %v449_v45, %v448_v61  ;;  %v556_v5 = vrot.slane %v547_v53, 6  ;;  %v523_v7 = vld [vmem:[%s1923_s13 + $0xb] sm:$0x1]  ;;  %v278_v13 = vld [vmem:[%s1923_s13 + $0x10] sm:$0x1]  ;;  %s1761_s20 = smov 90  }
  0x47   : > { %496 = vrot.lane.b32.xlu1 %v495_v60, %s1759_s18  ;;  %v511_v4 = vsel %vm288_vm1, %v509_v51, %v510_v62  ;;  %v559_v6 = vrot.slane %v548_v59, 5  ;;  %v451_v9 = vsel %vm298_vm5, %v449_v45, %v450_v3  ;;  %v554_v11 = vsel %vm286_vm0, %v553_v63, %v545_v58  ;;  %v279_v14 = vld [vmem:[%s1923_s13 + $0x20] sm:$0x1]  ;;  %v280_v20 = vld [vmem:[%s1923_s13 + $0x30] sm:$0x1]  ;;  %s1762_s11 = smov 126  }
  0x48   : > { %v513_v10 = vsel %vm291_vm2, %v512_v56, %v511_v4  ;;  %v531_v12 = vrot.slane %v524_v1, 7  ;;  %452 = vrot.lane.b32.xlu0 %v451_v9, %s1760_s19  ;;  %v555_v16 = vsel %vm288_vm1, %v553_v63, %v554_v11  ;;  %v534_v17 = vrot.slane %v525_v2, 6  ;;  %v277_v19 = vld [vmem:[%s1923_s13] sm:$0x1]  ;;  %v328_v25 = vld [vmem:[%s1923_s13 + $0x12] sm:$0x1] }
  0x49   : > { %v514_v15 = vsel %vm293_vm3, %v512_v56, %v513_v10  ;;  %v537_v18 = vrot.slane %v526_v8, 5  ;;  %v557_v22 = vsel %vm291_vm2, %v556_v5, %v555_v16  ;;  %v285_v24 = vrot.slane %v278_v13, 7  ;;  %v329_v30 = vld [vmem:[%s1923_s13 + $0x22] sm:$0x1]  ;;  %v330_v31 = vld [vmem:[%s1923_s13 + $0x32] sm:$0x1] }
  0x4a   : > { %v516_v21 = vsel %vm296_vm4, %v515_v57, %v514_v15  ;;  %v532_v23 = vsel %vm286_vm0, %v531_v12, %v523_v7  ;;  %v558_v27 = vsel %vm293_vm3, %v556_v5, %v557_v22  ;;  %v290_v29 = vrot.slane %v279_v14, 6  ;;  %v327_v36 = vld [vmem:[%s1923_s13 + $0x2] sm:$0x1]  ;;  %v306_v37 = vld [vmem:[%s1923_s13 + $0x11] sm:$0x1]  ;;  %s1763_s14 = smov 108  }
  0x4b   : > { %v517_v26 = vsel %vm298_vm5, %v515_v57, %v516_v21  ;;  %v533_v28 = vsel %vm288_vm1, %v531_v12, %v532_v23  ;;  %v560_v32 = vsel %vm296_vm4, %v559_v6, %v558_v27  ;;  %v287_v34 = vsel %vm286_vm0, %v285_v24, %v277_v19  ;;  %v307_v42 = vld [vmem:[%s1923_s13 + $0x21] sm:$0x1]  ;;  %v308_v43 = vld [vmem:[%s1923_s13 + $0x31] sm:$0x1]  ;;  %v350_v49 = vld [vmem:[%s1923_s13 + $0x13] sm:$0x1] }
  0x4c   : > { %518 = vrot.lane.b32.xlu1 %v517_v26, %s1761_s20  ;;  %v535_v33 = vsel %vm291_vm2, %v534_v17, %v533_v28  ;;  %v295_v35 = vrot.slane %v280_v20, 5  ;;  %v561_v38 = vsel %vm298_vm5, %v559_v6, %v560_v32  ;;  %v289_v40 = vsel %vm288_vm1, %v285_v24, %v287_v34  ;;  %v305_v48 = vld [vmem:[%s1923_s13 + $0x1] sm:$0x1]  ;;  %v351_v54 = vld [vmem:[%s1923_s13 + $0x23] sm:$0x1]  ;;  %s1764_s15 = smov 38  }
  0x4d   : > { %v536_v39 = vsel %vm293_vm3, %v534_v17, %v535_v33  ;;  %v335_v41 = vrot.slane %v328_v25, 7  ;;  %562 = vrot.lane.b32.xlu0 %v561_v38, %s1762_s11  ;;  %v292_v45 = vsel %vm291_vm2, %v290_v29, %v289_v40  ;;  %v338_v46 = vrot.slane %v329_v30, 6  ;;  %v352_v55 = vld [vmem:[%s1923_s13 + $0x33] sm:$0x1]  ;;  %v349_v60 = vld [vmem:[%s1923_s13 + $0x3] sm:$0x1] }
  0x4e   : > { %v538_v44 = vsel %vm296_vm4, %v537_v18, %v536_v39  ;;  %v341_v47 = vrot.slane %v330_v31, 5  ;;  %v294_v51 = vsel %vm293_vm3, %v290_v29, %v292_v45  ;;  %v313_v53 = vrot.slane %v306_v37, 7  ;;  %v573_v61 = vld [vmem:[%s1923_s13 + $0x1d] sm:$0x1]  ;;  %v574_v3 = vld [vmem:[%s1923_s13 + $0x2d] sm:$0x1] }
  0x4f   : > { %v539_v50 = vsel %vm298_vm5, %v537_v18, %v538_v44  ;;  %v336_v52 = vsel %vm286_vm0, %v335_v41, %v327_v36  ;;  %v297_v56 = vsel %vm296_vm4, %v295_v35, %v294_v51  ;;  %v316_v58 = vrot.slane %v307_v42, 6  ;;  %v572_v8 = vld [vmem:[%s1923_s13 + $0xd] sm:$0x1]  ;;  %v575_v9 = vld [vmem:[%s1923_s13 + $0x3d] sm:$0x1]  ;;  %s1765_s17 = smov 74  }
  0x50   : > { %540 = vrot.lane.b32.xlu1 %v539_v50, %s1763_s14  ;;  %v337_v57 = vsel %vm288_vm1, %v335_v41, %v336_v52  ;;  %v319_v59 = vrot.slane %v308_v43, 5  ;;  %v299_v62 = vsel %vm298_vm5, %v295_v35, %v297_v56  ;;  %v314_v1 = vsel %vm286_vm0, %v313_v53, %v305_v48  ;;  %v372_v14 = vld [vmem:[%s1923_s13 + $0x14] sm:$0x1]  ;;  %v373_v19 = vld [vmem:[%s1923_s13 + $0x24] sm:$0x1]  ;;  %s1766_s26 = smov 56  }
  0x51   : > { %v339_v63 = vsel %vm291_vm2, %v338_v46, %v337_v57  ;;  %v357_v2 = vrot.slane %v350_v49, 7  ;;  %300 = vrot.lane.b32.xlu0 %v299_v62, %s1764_s15  ;;  %v315_v5 = vsel %vm288_vm1, %v313_v53, %v314_v1  ;;  %v360_v6 = vrot.slane %v351_v54, 6  ;;  %v374_v20 = vld [vmem:[%s1923_s13 + $0x34] sm:$0x1]  ;;  %v371_v25 = vld [vmem:[%s1923_s13 + $0x4] sm:$0x1] }
  0x52   : > { %v340_v4 = vsel %vm293_vm3, %v338_v46, %v339_v63  ;;  %v363_v7 = vrot.slane %v352_v55, 5  ;;  %v317_v11 = vsel %vm291_vm2, %v316_v58, %v315_v5  ;;  %v580_v13 = vrot.slane %v573_v61, 7  ;;  %v595_v26 = vld [vmem:[%s1923_s13 + $0x1e] sm:$0x1]  ;;  %v596_v31 = vld [vmem:[%s1923_s13 + $0x2e] sm:$0x1] }
  0x53   : > { %v342_v10 = vsel %vm296_vm4, %v341_v47, %v340_v4  ;;  %v358_v12 = vsel %vm286_vm0, %v357_v2, %v349_v60  ;;  %v318_v16 = vsel %vm293_vm3, %v316_v58, %v317_v11  ;;  %v583_v18 = vrot.slane %v574_v3, 6  ;;  %v597_v32 = vld [vmem:[%s1923_s13 + $0x3e] sm:$0x1]  ;;  %v594_v37 = vld [vmem:[%s1923_s13 + $0xe] sm:$0x1]  ;;  %s1767_s28 = smov 92  }
  0x54   : > { %v343_v15 = vsel %vm298_vm5, %v341_v47, %v342_v10  ;;  %v359_v17 = vsel %vm288_vm1, %v357_v2, %v358_v12  ;;  %v320_v21 = vsel %vm296_vm4, %v319_v59, %v318_v16  ;;  %v581_v23 = vsel %vm286_vm0, %v580_v13, %v572_v8  ;;  %v617_v38 = vld [vmem:[%s1923_s13 + $0x1f] sm:$0x1]  ;;  %v618_v43 = vld [vmem:[%s1923_s13 + $0x2f] sm:$0x1]  ;;  %v394_v50 = vld [vmem:[%s1923_s13 + $0x15] sm:$0x1] }
  0x55   : > { %344 = vrot.lane.b32.xlu1 %v343_v15, %s1765_s17  ;;  %v361_v22 = vsel %vm291_vm2, %v360_v6, %v359_v17  ;;  %v586_v24 = vrot.slane %v575_v9, 5  ;;  %v321_v27 = vsel %vm298_vm5, %v319_v59, %v320_v21  ;;  %v582_v29 = vsel %vm288_vm1, %v580_v13, %v581_v23  ;;  %v619_v44 = vld [vmem:[%s1923_s13 + $0x3f] sm:$0x1]  ;;  %v616_v49 = vld [vmem:[%s1923_s13 + $0xf] sm:$0x1]  ;;  %s1768_s7 = smov 16  }
  0x56   : > { %v362_v28 = vsel %vm293_vm3, %v360_v6, %v361_v22  ;;  %v379_v30 = vrot.slane %v372_v14, 7  ;;  %322 = vrot.lane.b32.xlu0 %v321_v27, %s1766_s26  ;;  %v584_v34 = vsel %vm291_vm2, %v583_v18, %v582_v29  ;;  %v382_v35 = vrot.slane %v373_v19, 6  ;;  %v395_v55 = vld [vmem:[%s1923_s13 + $0x25] sm:$0x1]  ;;  %v396_v61 = vld [vmem:[%s1923_s13 + $0x35] sm:$0x1] }
  0x57   : > { %v364_v33 = vsel %vm296_vm4, %v363_v7, %v362_v28  ;;  %v385_v36 = vrot.slane %v374_v20, 5  ;;  %v585_v40 = vsel %vm293_vm3, %v583_v18, %v584_v34  ;;  %v602_v42 = vrot.slane %v595_v26, 7  ;;  %v393_v60 = vld [vmem:[%s1923_s13 + $0x5] sm:$0x1]  ;;  %s1769_s12 = smov 110   ;;  %s1770_s13 = smov 34  }
  0x58   : > { %v365_v39 = vsel %vm298_vm5, %v363_v7, %v364_v33  ;;  %v380_v41 = vsel %vm286_vm0, %v379_v30, %v371_v25  ;;  %v587_v45 = vsel %vm296_vm4, %v586_v24, %v585_v40  ;;  %v605_v47 = vrot.slane %v596_v31, 6  ;;  %s1771_s8 = smov 52   ;;  %s1772_s16 = smov 127  }
  0x59   : > { %366 = vrot.lane.b32.xlu1 %v365_v39, %s1767_s28  ;;  %v381_v46 = vsel %vm288_vm1, %v379_v30, %v380_v41  ;;  %v608_v48 = vrot.slane %v597_v32, 5  ;;  %v588_v51 = vsel %vm298_vm5, %v586_v24, %v587_v45  ;;  %v603_v53 = vsel %vm286_vm0, %v602_v42, %v594_v37  ;;  %s1773_s18 = smov 109   ;;  %s1775_s19 = smov 91  }
  0x5a   : > { %v383_v52 = vsel %vm291_vm2, %v382_v35, %v381_v46  ;;  %v624_v54 = vrot.slane %v617_v38, 7  ;;  %589 = vrot.lane.b32.xlu0 %v588_v51, %s1768_s7  ;;  %v604_v57 = vsel %vm288_vm1, %v602_v42, %v603_v53  ;;  %v627_v58 = vrot.slane %v618_v43, 6  ;;  %v755_v46 = vld [vmem:[%s2317_s2 + $0x8] sm:$0xff]  ;;  %s1778_s26 = smov 19   ;;  %s1496_s15 = smul.u32 384, %s1836_s25 }
  0x5b   : > { %v384_v56 = vsel %vm293_vm3, %v382_v35, %v383_v52  ;;  %v630_v59 = vrot.slane %v619_v44, 5  ;;  %v606_v63 = vsel %vm291_vm2, %v605_v47, %v604_v57  ;;  %v401_v2 = vrot.slane %v394_v50, 7  ;;  %s1275_s25 = scalar_lea.sflag [#allocation6], %s1919_s29  ;;  %p2328_p11 = scmp.ne.s32.totalorder %s2325_s9, 0 }
  0x5c   : > { %v386_v62 = vsel %vm296_vm4, %v385_v36, %v384_v56  ;;  %v625_v1 = vsel %vm286_vm0, %v624_v54, %v616_v49  ;;  %v607_v4 = vsel %vm293_vm3, %v605_v47, %v606_v63  ;;  %v404_v6 = vrot.slane %v395_v55, 6 }
  0x5d   : > { %v387_v3 = vsel %vm298_vm5, %v385_v36, %v386_v62  ;;  %v626_v5 = vsel %vm288_vm1, %v624_v54, %v625_v1  ;;  %v609_v7 = vsel %vm296_vm4, %v608_v48, %v607_v4  ;;  %v402_v9 = vsel %vm286_vm0, %v401_v2, %v393_v60 }
  0x5e   : > { %388 = vrot.lane.b32.xlu1 %v387_v3, %s1769_s12  ;;  %v628_v8 = vsel %vm291_vm2, %v627_v58, %v626_v5  ;;  %v407_v10 = vrot.slane %v396_v61, 5  ;;  %v610_v11 = vsel %vm298_vm5, %v608_v48, %v609_v7  ;;  %v403_v13 = vsel %vm288_vm1, %v401_v2, %v402_v9 }
  0x5f   : > { %v629_v12 = vsel %vm293_vm3, %v627_v58, %v628_v8  ;;  %611 = vrot.lane.b32.xlu0 %v610_v11, %s1770_s13  ;;  %v405_v15 = vsel %vm291_vm2, %v404_v6, %v403_v13  ;;  %vm411_vm6 = vcmask 125952   ;;  %vm271_vm7 = vcmask 863232  }
  0x60   : > { %v631_v14 = vsel %vm296_vm4, %v630_v59, %v629_v12  ;;  %v406_v17 = vsel %vm293_vm3, %v404_v6, %v405_v15  ;;  %272 = vst.msk [vmem:[#allocation2 + $0x8] sm:$0xf] %vm271_vm7, %v1756_v0  ;;  %vm433_vm8 = vcmask 273552   ;;  %vm455_vm9 = vcmask 421152  }
  0x61   : > { %v632_v16 = vsel %vm298_vm5, %v630_v59, %v631_v14  ;;  %v408_v18 = vsel %vm296_vm4, %v407_v10, %v406_v17  ;;  %vm477_vm10 = vcmask 568752   ;;  %vm499_vm11 = vcmask 716352  }
  0x62   : > { %v409_v19 = vsel %vm298_vm5, %v407_v10, %v408_v18  ;;  %vm521_vm12 = vcmask 863952   ;;  %vm568_vm13 = vcmask 1044464   ;;  %vm569_vm14 = vcmask 113668  }
  0x63   : > { %633 = vrot.lane.b32.xlu0 %v632_v16, %s1771_s8  ;;  %412 = vst.msk [vmem:[#allocation2 + $0x4] sm:$0xf] %vm411_vm6, %v409_v19  ;;  %vm565_vm15 = vcmask 1031168   ;;  %vm543_vm0 = vcmask 1011552   ;;  %vm570_vm1 = vmor %vm569_vm14, %vm568_vm13  ;;  %vm303_vm2 = vcmask 437552   ;;  %vm325_vm3 = vcmask 585152  }
  0x64   : > { %vm347_vm4 = vcmask 732752   ;;  %vm369_vm5 = vcmask 880352   ;;  %vm592_vm6 = vcmask 257152   ;;  %vm391_vm7 = vcmask 1027952  }
  0x65   : > { %v1774_v43 = vmov 0.0|0.0   ;;  %v1777_v45 = vmov 0   ;;  %vm711_vm13 = vcmask 752640   ;;  %vm699_vm14 = vcmask 883712  }
  0x66   : > { %1451 = vmatprep.subr.bf16.mxu1 %v1774_v43  ;;  %1603 = vset.pattern.permute.xlu0 %v1777_v45 }
  0x67   : > { %1639 = vset.pattern.permute.xlu1 %v1777_v45 }
  0xb5   : > { %v475_v20 = vpop.permute.xlu1 %474 }
  0xb6   : > { %v431_v21 = vpop.permute.xlu0 %430 }
  0xb7   : > { %434 = vst.msk [vmem:[#allocation2 + $0x4] sm:$0xf] %vm433_vm8, %v431_v21  ;;  %vm614_vm8 = vcmask 404752  }
  0xb9   : > { %v497_v22 = vpop.permute.xlu1 %496 }
  0xba   : > { %v453_v23 = vpop.permute.xlu0 %452 }
  0xbb   : > { %456 = vst.msk [vmem:[#allocation2 + $0x4] sm:$0xf] %vm455_vm9, %v453_v23  ;;  %vm636_vm9 = vcmask 552352  }
  0xbc   : > { %478 = vst.msk [vmem:[#allocation2 + $0x4] sm:$0xf] %vm477_vm10, %v475_v20  ;;  %vm1776_vm10 = vmmov 0  }
  0xbd   : > { %500 = vst.msk [vmem:[#allocation2 + $0x4] sm:$0xf] %vm499_vm11, %v497_v22  ;;  %1413 = vmatprep.mubr.msk.f32.mxu1 %vm1776_vm10, %v1756_v0  ;;  %vm652_vm11 = vcmask 1039360  }
  0xbe   : > { %v519_v24 = vpop.permute.xlu1 %518 }
  0xbf   : > { %522 = vst.msk [vmem:[#allocation2 + $0x4] sm:$0xf] %vm521_vm12, %v519_v24  ;;  %v563_v25 = vpop.permute.xlu0 %562  ;;  %vm687_vm12 = vcmask 891904  }
  0xc0   : > { %v564_v26 = vrot.slane %v563_v25, 4 }
  0xc2   : > { %v541_v27 = vpop.permute.xlu1 %540  ;;  %v566_v28 = vsel %vm565_vm15, %v564_v26, %v563_v25 }
  0xc3   : > { %544 = vst.msk [vmem:[#allocation2 + $0x4] sm:$0xf] %vm543_vm0, %v541_v27  ;;  %v301_v29 = vpop.permute.xlu0 %300  ;;  %vm738_vm0 = vcmask 1043456  }
  0xc4   : > { %571 = vst.msk [vmem:[#allocation2 + $0x4] sm:$0xff] %vm570_vm1, %v566_v28  ;;  %vm675_vm1 = vcmask 900096  }
  0xc5   : > { %304 = vst.msk [vmem:[#allocation2] sm:$0xf] %vm303_vm2, %v301_v29  ;;  %vm723_vm2 = vcmask 744448  }
  0xc7   : > { %v345_v30 = vpop.permute.xlu1 %344 }
  0xc8   : > { %v323_v31 = vpop.permute.xlu0 %322 }
  0xc9   : > { %326 = vst.msk [vmem:[#allocation2] sm:$0xf] %vm325_vm3, %v323_v31  ;;  %vm735_vm3 = vcmask 736256  }
  0xca   : > { %348 = vst.msk [vmem:[#allocation2] sm:$0xf] %vm347_vm4, %v345_v30  ;;  %vm772_vm4 = vcmask 293888  }
  0xcb   : > { %v367_v32 = vpop.permute.xlu1 %366 }
  0xcc   : > { %370 = vst.msk [vmem:[#allocation2] sm:$0xf] %vm369_vm5, %v367_v32  ;;  %v590_v33 = vpop.permute.xlu0 %589  ;;  %vm275_vm5 = vcmask 867328  }
  0xcd   : > { %593 = vst.msk [vmem:[#allocation2 + $0x8] sm:$0xf] %vm592_vm6, %v590_v33  ;;  %vm992_vm6 = vcmask 1047704  }
  0xce   : > { %276 = vst.msk [vmem:[#allocation3 + $0x10] sm:$0xff] %vm275_vm5, %v1756_v0 }
  0xd0   : > { %v389_v34 = vpop.permute.xlu1 %388 }
  0xd1   : > { %392 = vst.msk [vmem:[#allocation2] sm:$0xf] %vm391_vm7, %v389_v34  ;;  %v612_v35 = vpop.permute.xlu0 %611  ;;  %vm986_vm7 = vcmask 154624  }
  0xd2   : > { %615 = vst.msk [vmem:[#allocation2 + $0x8] sm:$0xf] %vm614_vm8, %v612_v35  ;;  %vm995_vm8 = vcmask 711680  }
  0xd5   : > { %v634_v36 = vpop.permute.xlu0 %633 }
  0xd6   : > { %637 = vst.msk [vmem:[#allocation2 + $0x8] sm:$0xf] %vm636_vm9, %v634_v36  ;;  %vm1272_vm9 = vcmask 556032  }
  0xd8   : > { %v2099_v37 = vld [vmem:[#allocation2] sm:$0xff] }
  0xd9   : > { %658 = vrot.lane.b32.xlu1 %v2099_v37, %s1762_s11  ;;  %v644_v38 = vcombine.low %v2099_v37, %v2099_v37  ;;  %v2110_v39 = vcombine.high %v2099_v37, %v2099_v37 }
  0xdb   : > { %646 = vrot.lane.b32.xlu0 %v644_v38, %s1772_s16 }
  0xdd   : > { %681 = vrot.lane.b32.xlu1 %v2099_v37, %s1773_s18  ;;  %v2112_v40 = vld [vmem:[#allocation2 + $0x8] sm:$0xf] }
  0xde   : > { %v1573_v41 = vpack.i.bf16 %v2112_v40, %v2110_v39  ;;  %v645_v42 = vcombine.low %v2112_v40, %v2112_v40 }
  0xdf   : > { %669 = vrot.lane.b32.xlu0 %v644_v38, %s1769_s12 }
  0xe0   : > { %v1583_v44 = vpack.i.bf16 %v645_v42, %v2099_v37 }
  0xe1   : > { %1574 = vrot.lane.b32.xlu1 %v1573_v41, %s1773_s18 }
  0xe3   : > { %693 = vrot.lane.b32.xlu0 %v644_v38, %s1763_s14 }
  0xe5   : > { %1579 = vrot.lane.b32.xlu1 %v1573_v41, %s1767_s28 }
  0xe7   : > { %1569 = vrot.lane.b32.xlu0 %v1573_v41, %s1762_s11 }
  0xe9   : > { %1584 = vrot.lane.b32.xlu1 %v1583_v44, %s1772_s16 }
  0xeb   : > { %1594 = vrot.lane.b32.xlu0 %v1583_v44, %s1763_s14 }
  0xed   : > { %1589 = vrot.lane.b32.xlu1 %v1583_v44, %s1769_s12 }
  0xef   : > { %1599 = vrot.lane.b32.xlu0 %v1583_v44, %s1775_s19 }
  0xf1   : > { %705 = vrot.lane.b32.xlu1 %v2099_v37, %s1767_s28 }
  0xf3   : > { %717 = vrot.lane.b32.xlu0 %v644_v38, %s1775_s19 }
  0xf5   : > { %731 = vrot.lane.b32.xlu1 %v2110_v39, %s1761_s20 }
  0xf7   : > { %733 = vrot.lane.b32.xlu0 %v2112_v40, %s1761_s20 }
  0xf9   : > { %729 = vrot.lane.b32.xlu1 %v2099_v37, %s1761_s20 }
  0xfb   : > { %764 = vperm.xlu0 %1603, %v755_v46  }
 0x14b   : > { %v659_v47 = vpop.permute.xlu1 %658 }
 0x14d   : > { %v647_v48 = vpop.permute.xlu0 %646 }
 0x14f   : > { %v682_v49 = vpop.permute.xlu1 %681 }
 0x151   : > { %v670_v50 = vpop.permute.xlu0 %669 }
 0x153   : > { %v1575_v51 = vpop.permute.xlu1 %1574 }
 0x154   : > { %v1577_v55 = vunpack.i.h.bf16 %v1575_v51  ;;  %v1576_v56 = vunpack.i.l.bf16 %v1575_v51  ;;  %v752_v51 = vld [vmem:[%s2316_s1 + $0x8] sm:$0xff] }
 0x155   : > { %v694_v52 = vpop.permute.xlu0 %693 }
 0x156   : > { %v688_v5 = vsel %vm687_vm12, %v682_v49, %v1576_v56  ;;  %v689_v6 = vsel %vm687_vm12, %v1576_v56, %v1577_v55  ;;  %v751_v49 = vld [vmem:[%s2316_s1] sm:$0xff] }
 0x157   : > { %v1580_v53 = vpop.permute.xlu1 %1579 }
 0x158   : > { %v1582_v57 = vunpack.i.h.bf16 %v1580_v53  ;;  %v1581_v58 = vunpack.i.l.bf16 %v1580_v53 }
 0x159   : > { %v1570_v54 = vpop.permute.xlu0 %1569 }
 0x15a   : > { %v1572_v59 = vunpack.i.h.bf16 %v1570_v54  ;;  %v1571_v60 = vunpack.i.l.bf16 %v1570_v54  ;;  %v713_v9 = vsel %vm711_vm13, %v1581_v58, %v1582_v57 }
 0x15b   : > { %v1585_v61 = vpop.permute.xlu1 %1584 }
 0x15c   : > { %v1587_v62 = vunpack.i.h.bf16 %v1585_v61  ;;  %v1586_v63 = vunpack.i.l.bf16 %v1585_v61  ;;  %v665_v8 = vsel %vm565_vm15, %v1571_v60, %v1572_v59  ;;  %v664_v13 = vsel %vm565_vm15, %v659_v47, %v1571_v60 }
 0x15d   : > { %v1595_v1 = vpop.permute.xlu0 %1594 }
 0x15e   : > { %v1597_v2 = vunpack.i.h.bf16 %v1595_v1  ;;  %v1596_v3 = vunpack.i.l.bf16 %v1595_v1  ;;  %v654_v4 = vsel %vm652_vm11, %v1586_v63, %v1587_v62  ;;  %v653_v12 = vsel %vm652_vm11, %v647_v48, %v1586_v63 }
 0x15f   : > { %v1590_v7 = vpop.permute.xlu1 %1589  ;;  %v741_v17 = vsel %vm738_vm0, %v2112_v40, %v1587_v62  ;;  %v740_v18 = vsel %vm738_vm0, %v2110_v39, %v654_v4  ;;  %v739_v27 = vsel %vm738_vm0, %v2099_v37, %v653_v12 }
 0x160   : > { %v1592_v10 = vunpack.i.h.bf16 %v1590_v7  ;;  %v1591_v11 = vunpack.i.l.bf16 %v1590_v7  ;;  %v700_v14 = vsel %vm699_vm14, %v694_v52, %v1596_v3  ;;  %v701_v15 = vsel %vm699_vm14, %v1596_v3, %v1597_v2 }
 0x161   : > { %v1600_v16 = vpop.permute.xlu0 %1599  ;;  %v746_v31 = vsel %vm738_vm0, %v689_v6, %v701_v15  ;;  %v747_v35 = vsel %vm738_vm0, %v1577_v55, %v1597_v2  ;;  %v745_v44 = vsel %vm738_vm0, %v688_v5, %v700_v14  ;;  %v959_v52 = vlaneseq }
 0x162   : > { %v1602_v19 = vunpack.i.h.bf16 %v1600_v16  ;;  %v1601_v20 = vunpack.i.l.bf16 %v1600_v16  ;;  %v744_v21 = vsel %vm738_vm0, %v1572_v59, %v1592_v10  ;;  %v677_v22 = vsel %vm675_vm1, %v1591_v11, %v1592_v10  ;;  %v957_v59 = vld [vmem:[%s2320_s5] sm:$0x7] }
 0x163   : > { %v706_v23 = vpop.permute.xlu1 %705  ;;  %v1452_v24 = vpack.c.bf16 %v744_v21, %v741_v17  ;;  %v743_v25 = vsel %vm738_vm0, %v665_v8, %v677_v22  ;;  %v676_v26 = vsel %vm675_vm1, %v670_v50, %v1591_v11  ;;  %v960_v53 = vshrl.u32 %v959_v52, 7 }
 0x164   : > { %v1443_v28 = vpack.c.bf16 %v743_v25, %v740_v18  ;;  %v742_v29 = vsel %vm738_vm0, %v664_v13, %v676_v26  ;;  %v725_v30 = vsel %vm723_vm2, %v1601_v20, %v1602_v19  ;;  %v750_v36 = vsel %vm738_vm0, %v1582_v57, %v1602_v19  ;;  %v756_v25 = vld [vmem:[%s2317_s2 + $0x10] sm:$0xff]  ;;  %v754_v26 = vld [vmem:[%s2317_s2] sm:$0xff] }
 0x165   : > { %v718_v32 = vpop.permute.xlu0 %717  ;;  %1453 = vmatpush3.bf16.msra.mxu1 %v1452_v24  ;;  %v1445_v33 = vpack.c.bf16 %v742_v29, %v739_v27  ;;  %v749_v34 = vsel %vm738_vm0, %v713_v9, %v725_v30  ;;  %v712_v38 = vsel %vm711_vm13, %v706_v23, %v1581_v58  ;;  %v1455_v42 = vpack.c.bf16 %v750_v36, %v747_v35  ;;  %v753_v24 = vld [vmem:[%s2316_s1 + $0x10] sm:$0xff]  ;;  %v1092_v27 = vld [vmem:[%s2319_s4] sm:$0xff] }
 0x166   : > { %v724_v37 = vsel %vm723_vm2, %v718_v32, %v1601_v20  ;;  %1444 = vmatprep.subr.bf16.mxu0 %v1443_v28  ;;  %v1447_v39 = vpack.c.bf16 %v749_v34, %v746_v31  ;;  %1454 = vmatprep.subr.bf16.mxu1 %v1774_v43  ;;  %v969_v56 = vsub.s32 2, %v960_v53  ;;  %v961_v61 = vsub.s32 0, %v960_v53 }
 0x167   : > { %v748_v40 = vsel %vm738_vm0, %v712_v38, %v724_v37  ;;  %v732_v41 = vpop.permute.xlu1 %731  ;;  %1446 = vmatpush1.bf16.msra.mxu0 %v1445_v33  ;;  %v965_v8 = vsub.s32 1, %v960_v53 }
 0x168   : > { %1448 = vmatprep.subr.bf16.mxu0 %v1447_v39  ;;  %v1449_v45 = vpack.c.bf16 %v748_v40, %v745_v44  ;;  %v970_v1 = vrot.slane %v957_v59, %v969_v56  ;;  %v962_v5 = vrot.slane %v957_v59, %v961_v61 }
 0x169   : > { %v734_v46 = vpop.permute.xlu0 %733  ;;  %1456 = vmatpush3.bf16.msra.mxu1 %v1455_v42  ;;  %v966_v14 = vrot.slane %v957_v59, %v965_v8 }
 0x16a   : > { %v737_v47 = vsel %vm735_vm3, %v732_v41, %v734_v46  ;;  %1411 = vmatprep.subr.mxu1 %v1756_v0 }
 0x16b   : > { %v730_v48 = vpop.permute.xlu1 %729  ;;  %1450 = vmatpush1.bf16.msra.mxu0 %v1449_v45 }
 0x16c   : > { %1367 = vmatprep.subr.msk.mxu0 %vm738_vm0, %v737_v47  ;;  %v736_v50 = vsel %vm735_vm3, %v730_v48, %v732_v41 }
 0x16d   : > { %1412 = vmatpush3.msk.msra.mxu1 %vm738_vm0, %v734_v46 }
 0x16e   : > { %1414 = vmatmul.mubr.msk.f32.vlgmr.msra.gmra.mrb[0].mxu1 %vm772_vm4, %v751_v49  ;;  %1473 = vmatprep.subr.bf16.mxu1 %v1774_v43 }
 0x16f   : > { %1368 = vmatpush1.msk.msra.mxu0 %vm738_vm0, %v736_v50  ;;  %1416 = vmatprep.mubr.msk.f32.mxu1 %vm1776_vm10, %v1756_v0 }
 0x170   : > { %1369 = vmatmul.mubr.msk.f32.vlgmr.msra.gmra.mrb[0].mxu0 %vm772_vm4, %v751_v49 }
 0x171   : > { %858 = vmatprep.mubr.f32.mxu0 %v1756_v0 }
 0x172   : > { %1417 = vmatmul.mubr.msk.f32.gmra.mrb[2].mxu1 %vm772_vm4, %v752_v51 }
 0x173   : > { %1419 = vmatprep.mubr.msk.f32.mxu1 %vm1776_vm10, %v1756_v0 }
 0x174   : > { %1370 = vmatmul.mubr.msk.f32.gmra.mrb[2].mxu0 %vm772_vm4, %v752_v51 }
 0x175   : > { %864 = vmatprep.mubr.f32.mxu0 %v1756_v0 }
 0x176   : > { %1420 = vmatmul.mubr.msk.f32.gmra.mrb[4].mxu1 %vm772_vm4, %v753_v24 }
 0x177   : > { %1440 = vmatprep.mubr.msk.f32.mxu1 %vm1776_vm10, %v1756_v0 }
 0x178   : > { %1371 = vmatmul.mubr.msk.f32.gmra.mrb[4].mxu0 %vm772_vm4, %v753_v24 }
 0x179   : > { %1166 = vmatprep.mubr.f32.mxu0 %v1756_v0 }
 0x17a   : > { %v765_v58 = vpop.permute.xlu0 %764 }
 0x241   : > { %v2196_v54 = vpop.f32.mrb[0].mxu1 }
 0x242   : > { %v1415_v55 = vpop.f32.mrb[1].mxu1 }
 0x243   : > { %v2199_v57 = vpop.f32.mrb[0].mxu0 }
 0x244   : > { %v2204_v60 = vpop.f32.mrb[1].mxu0 }
 0x245   : > { %v942_v62 = vpop.f32.mrb[2].mxu1 }
 0x246   : > { %v943_v63 = vadd.f32 %v942_v62, %v765_v58  ;;  %v1418_v2 = vpop.f32.mrb[3].mxu1 }
 0x247   : > { %v860_v3 = vpop.f32.mrb[2].mxu0 }
 0x248   : > { %v861_v4 = vadd.f32 %v860_v3, %v765_v58  ;;  %v956_v6 = vmax.f32 %v943_v63, 0.0  ;;  %v862_v7 = vpop.f32.mrb[3].mxu0 }
 0x249   : > { %v863_v9 = vadd.f32 %v862_v7, %v765_v58 }
 0x24a   : > { %v954_v10 = vmax.f32 %v861_v4, 0.0  ;;  %v976_v11 = vmul.f32 %v970_v1, %v956_v6 }
 0x24b   : > { %v955_v13 = vmax.f32 %v863_v9, 0.0 }
 0x24c   : > { %v974_v12 = vmul.f32 %v962_v5, %v954_v10  ;;  %984 = vrot.lane.b32.xlu0 %v976_v11, %s1778_s26 }
 0x24d   : > { %v975_v15 = vmul.f32 %v966_v14, %v955_v13 }
 0x24e   : > { %980 = vrot.lane.b32.xlu1 %v974_v12, %s1778_s26 }
 0x252   : > { %982 = vrot.lane.b32.xlu1 %v975_v15, %s1778_s26 }
 0x2be   : > { %v985_v17 = vpop.permute.xlu0 %984 }
 0x2c0   : > { %v981_v16 = vpop.permute.xlu1 %980 }
 0x2c1   : > { %993 = vst.msk [vmem:[#allocation3] sm:$0xff] %vm992_vm6, %v981_v16 }
 0x2c4   : > { %v983_v18 = vpop.permute.xlu1 %982 }
 0x2c5   : > { %v987_v19 = vsel %vm986_vm7, %v981_v16, %v983_v18  ;;  %v988_v20 = vsel %vm986_vm7, %v983_v18, %v985_v17 }
 0x2c6   : > { %996 = vst.msk [vmem:[#allocation3 + $0x10] sm:$0xff] %vm995_vm8, %v988_v20 }
 0x2c8   : > { %v997_v21 = vld [vmem:[#allocation3] sm:$0xff] }
 0x2c9   : > { %1014 = vrot.lane.b32.xlu1 %v997_v21, %s1762_s11  ;;  %1003 = vrot.lane.b32.xlu0 %v997_v21, %s1772_s16 }
 0x2cd   : > { %1036 = vrot.lane.b32.xlu1 %v997_v21, %s1773_s18  ;;  %1025 = vrot.lane.b32.xlu0 %v997_v21, %s1769_s12  ;;  %v999_v22 = vld [vmem:[#allocation3 + $0x10] sm:$0xff] }
 0x2ce   : > { %v1614_v23 = vpack.i.bf16 %v999_v22, %v987_v19 }
 0x2d1   : > { %1058 = vrot.lane.b32.xlu1 %v997_v21, %s1767_s28  ;;  %1047 = vrot.lane.b32.xlu0 %v997_v21, %s1763_s14 }
 0x2d5   : > { %1615 = vrot.lane.b32.xlu0 %v1614_v23, %s1769_s12  ;;  %1605 = vrot.lane.b32.xlu1 %v1614_v23, %s1772_s16  ;;  %s2271_s12 = scalar_lea.hbm %s2321_s6, %s1496_s15 }
 0x2d9   : > { %1625 = vrot.lane.b32.xlu0 %v1614_v23, %s1763_s14  ;;  %1610 = vrot.lane.b32.xlu1 %v1614_v23, %s1762_s11  ;;  %s1779_s11 = smov [#allocation7]  }
 0x2da   : > { %s1689_s14 = sshll.u32 %s1779_s11, 4  ;;  %s1690_s14 = int_to_ptr.vmem [resolvable:$false] %s1689_s14 }
 0x2dd   : > { %1635 = vrot.lane.b32.xlu0 %v1614_v23, %s1775_s19  ;;  %1620 = vrot.lane.b32.xlu1 %v1614_v23, %s1773_s18  ;;  %s1691_s18 = scalar_lea.vmem %s1690_s14, 768 }
 0x2e1   : > { %1069 = vrot.lane.b32.xlu0 %v997_v21, %s1775_s19  ;;  %1630 = vrot.lane.b32.xlu1 %v1614_v23, %s1767_s28  ;;  %s1495_s19 = smul.u32 24, %s1919_s29 }
 0x2e3   : > { %s269_s17 = scalar_lea.vmem [#allocation7], %s1495_s19 }
 0x2e4   : > { %s1289_s26 = sshll.u32 %s269_s17, 4  ;;  %s2273_s26 = int_to_ptr.vmem [resolvable:$true] %s1289_s26 }
 0x2e5   : > { %1084 = vrot.lane.b32.xlu0 %v999_v22, %s1761_s20  ;;  %1082 = vrot.lane.b32.xlu1 %v987_v19, %s1761_s20  ;;  %s1685_s16 = scalar_lea.vmem %s2273_s26, 384  ;;  %p1692_p8 = scmp.lt.s32.totalorder %s2273_s26, %s1690_s14 }
 0x2e6   : > { %p1686_p6 = scmp.ne.s32.totalorder %s2273_s26, %s1685_s16  ;;  %p1693_p10 = scmp.lt.s32.totalorder %s1691_s18, %s1685_s16 }
 0x2e8   : > { %p1687_p12 = pnand %p1686_p6, %p2328_p11  ;;  %p1694_p0 = por %p1693_p10, %p1692_p8 }
 0x2e9   : > { %769 = vperm.xlu0 %1603, %v756_v25   ;;  %1080 = vrot.lane.b32.xlu1 %v997_v21, %s1761_s20  ;;  %v1091_v25 = vld [vmem:[%s2318_s3] sm:$0xff] }
 0x2ea   : > { %p1688_p13 = pneg %p1687_p12 }
 0x2ec   : > { %p1695_p2 = pnand %p1694_p0, %p1688_p13 }
 0x2ed   : > { %759 = vperm.xlu0 %1603, %v754_v26   ;;  %1095 = vperm.xlu1 %1639, %v1092_v27  }
 0x33b   : > { %v1004_v28 = vpop.permute.xlu0 %1003  ;;  %v1015_v29 = vpop.permute.xlu1 %1014 }
 0x33f   : > { %v1026_v30 = vpop.permute.xlu0 %1025  ;;  %v1037_v31 = vpop.permute.xlu1 %1036 }
 0x343   : > { %v1048_v32 = vpop.permute.xlu0 %1047  ;;  %v1059_v33 = vpop.permute.xlu1 %1058 }
 0x347   : > { %v1616_v34 = vpop.permute.xlu0 %1615  ;;  %v1606_v35 = vpop.permute.xlu1 %1605 }
 0x348   : > { %v1608_v36 = vunpack.i.h.bf16 %v1606_v35  ;;  %v1607_v38 = vunpack.i.l.bf16 %v1606_v35  ;;  %v1618_v37 = vunpack.i.h.bf16 %v1616_v34  ;;  %v1617_v39 = vunpack.i.l.bf16 %v1616_v34 }
 0x34a   : > { %v1474_v40 = vpack.c.bf16 %v1608_v36, %v999_v22  ;;  %v1009_v41 = vsel %vm652_vm11, %v1004_v28, %v1607_v38  ;;  %v1010_v42 = vsel %vm652_vm11, %v1607_v38, %v1608_v36  ;;  %v1031_v50 = vsel %vm675_vm1, %v1026_v30, %v1617_v39 }
 0x34b   : > { %v1459_v44 = vpack.c.bf16 %v1009_v41, %v997_v21  ;;  %v1626_v45 = vpop.permute.xlu0 %1625  ;;  %v1611_v46 = vpop.permute.xlu1 %1610  ;;  %v1457_v47 = vpack.c.bf16 %v1010_v42, %v987_v19  ;;  %v1032_v52 = vsel %vm675_vm1, %v1617_v39, %v1618_v37 }
 0x34c   : > { %v1613_v48 = vunpack.i.h.bf16 %v1611_v46  ;;  %v1612_v49 = vunpack.i.l.bf16 %v1611_v46  ;;  %1475 = vmatpush3.bf16.msra.mxu1 %v1474_v40  ;;  %v1627_v51 = vunpack.i.l.bf16 %v1626_v45  ;;  %v1628_v53 = vunpack.i.h.bf16 %v1626_v45 }
 0x34d   : > { %1458 = vmatprep.subr.bf16.mxu0 %v1457_v47  ;;  %1476 = vmatprep.subr.bf16.mxu1 %v1774_v43 }
 0x34e   : > { %v1477_v55 = vpack.c.bf16 %v1618_v37, %v1613_v48  ;;  %v1020_v56 = vsel %vm565_vm15, %v1015_v29, %v1612_v49  ;;  %1460 = vmatpush1.bf16.msra.mxu0 %v1459_v44  ;;  %v1021_v58 = vsel %vm565_vm15, %v1612_v49, %v1613_v48  ;;  %v1053_v3 = vsel %vm699_vm14, %v1048_v32, %v1627_v51 }
 0x34f   : > { %v1463_v59 = vpack.c.bf16 %v1031_v50, %v1020_v56  ;;  %v1636_v61 = vpop.permute.xlu0 %1635  ;;  %v1621_v62 = vpop.permute.xlu1 %1620  ;;  %v1461_v63 = vpack.c.bf16 %v1032_v52, %v1021_v58  ;;  %v1054_v9 = vsel %vm699_vm14, %v1627_v51, %v1628_v53  ;;  %vm1098_vm15 = vcmask 588800  }
 0x350   : > { %v1623_v1 = vunpack.i.h.bf16 %v1621_v62  ;;  %v1622_v2 = vunpack.i.l.bf16 %v1621_v62  ;;  %1478 = vmatpush3.bf16.msra.mxu1 %v1477_v55  ;;  %v1638_v4 = vunpack.i.h.bf16 %v1636_v61  ;;  %v1637_v5 = vunpack.i.l.bf16 %v1636_v61 }
 0x351   : > { %1462 = vmatprep.subr.bf16.mxu0 %v1461_v63  ;;  %1479 = vmatprep.subr.bf16.mxu1 %v1774_v43 }
 0x352   : > { %v1480_v6 = vpack.c.bf16 %v1628_v53, %v1623_v1  ;;  %v1042_v7 = vsel %vm687_vm12, %v1037_v31, %v1622_v2  ;;  %1464 = vmatpush1.bf16.msra.mxu0 %v1463_v59  ;;  %v1043_v8 = vsel %vm687_vm12, %v1622_v2, %v1623_v1  ;;  %v1076_v16 = vsel %vm723_vm2, %v1637_v5, %v1638_v4 }
 0x353   : > { %v1467_v10 = vpack.c.bf16 %v1053_v3, %v1042_v7  ;;  %v1070_v11 = vpop.permute.xlu0 %1069  ;;  %v1631_v12 = vpop.permute.xlu1 %1630  ;;  %v1465_v13 = vpack.c.bf16 %v1054_v9, %v1043_v8 }
 0x354   : > { %v1633_v14 = vunpack.i.h.bf16 %v1631_v12  ;;  %v1632_v15 = vunpack.i.l.bf16 %v1631_v12  ;;  %1481 = vmatpush3.bf16.msra.mxu1 %v1480_v6  ;;  %v1075_v17 = vsel %vm723_vm2, %v1070_v11, %v1637_v5 }
 0x355   : > { %1466 = vmatprep.subr.bf16.mxu0 %v1465_v13  ;;  %1482 = vmatprep.subr.bf16.mxu1 %v1774_v43 }
 0x356   : > { %v1483_v18 = vpack.c.bf16 %v1638_v4, %v1633_v14  ;;  %v1064_v19 = vsel %vm711_vm13, %v1059_v33, %v1632_v15  ;;  %1468 = vmatpush1.bf16.msra.mxu0 %v1467_v10  ;;  %v1065_v20 = vsel %vm711_vm13, %v1632_v15, %v1633_v14 }
 0x357   : > { %v1471_v21 = vpack.c.bf16 %v1075_v17, %v1064_v19  ;;  %v1085_v22 = vpop.permute.xlu0 %1084  ;;  %v1083_v23 = vpop.permute.xlu1 %1082  ;;  %v1469_v24 = vpack.c.bf16 %v1076_v16, %v1065_v20 }
 0x358   : > { %1484 = vmatpush3.bf16.msra.mxu1 %v1483_v18  ;;  %v1087_v43 = vsel %vm735_vm3, %v1083_v23, %v1085_v22 }
 0x359   : > { %1470 = vmatprep.subr.bf16.mxu0 %v1469_v24  ;;  %1438 = vmatprep.subr.mxu1 %v1756_v0 }
 0x35a   : > { %1472 = vmatpush1.bf16.msra.mxu0 %v1471_v21 }
 0x35b   : > { %v1081_v26 = vpop.permute.xlu1 %1080  ;;  %1118 = vmatprep.subr.mxu0 %v1087_v43 }
 0x35c   : > { %v1086_v27 = vsel %vm735_vm3, %v1081_v26, %v1083_v23  ;;  %1439 = vmatpush3.msra.mxu1 %v1085_v22 }
 0x35d   : > { %1441 = vmatmul.mubr.msk.f32.vlgmr.msra.gmra.mrb[4].mxu1 %vm1098_vm15, %v1091_v25 }
 0x35e   : > { %1119 = vmatpush1.msra.mxu0 %v1086_v27 }
 0x35f   : > { %1376 = vmatmul.mubr.msk.f32.vlgmr.msra.gmra.mrb[4].mxu0 %vm1098_vm15, %v1091_v25 }
 0x368   : > { %v770_v29 = vpop.permute.xlu0 %769 }
 0x36c   : > { %v1096_v28 = vpop.permute.xlu1 %1095  ;;  %v760_v47 = vpop.permute.xlu0 %759 }
 0x36d   : > { %v1485_v30 = vadd.f32 %v1096_v28, %v770_v29  ;;  %v938_v48 = vadd.f32 %v2196_v54, %v760_v47  ;;  %v855_v49 = vadd.f32 %v2199_v57, %v760_v47  ;;  %v857_v51 = vadd.f32 %v2204_v60, %v760_v47 }
 0x36f   : > { %v953_v52 = vmax.f32 %v938_v48, 0.0  ;;  %v951_v58 = vmax.f32 %v855_v49, 0.0  ;;  %v952_v54 = vmax.f32 %v857_v51, 0.0 }
 0x430   : > { %v1239_v0 = vpop.f32.mrb[4].mxu1 }
 0x431   : > { %v1490_v31 = vadd.f32 %v1485_v30, %v1239_v0  ;;  %v1442_v32 = vpop.f32.mrb[5].mxu1 }
 0x432   : > { %v1168_v33 = vpop.f32.mrb[4].mxu0 }
 0x433   : > { %v1380_v34 = vmul.f32 -1.442695, %v1490_v31  ;;  %v1486_v35 = vadd.f32 %v1485_v30, %v1168_v33  ;;  %v1170_v36 = vpop.f32.mrb[5].mxu0 }
 0x434   : > { %v1488_v38 = vadd.f32 %v1485_v30, %v1170_v36 }
 0x435   : > { %1643 = vpow2.f32 %v1380_v34  ;;  %v1378_v37 = vmul.f32 -1.442695, %v1486_v35 }
 0x436   : > { %v1379_v39 = vmul.f32 -1.442695, %v1488_v38 }
 0x437   : > { %1645 = vpow2.f32 %v1378_v37 }
 0x438   : > { %1647 = vpow2.f32 %v1379_v39 }
 0x43f   : > { %v1644_v40 = vpop.eup %1643 }
 0x440   : > { %v1257_v41 = vadd.f32 1.0, %v1644_v40 }
 0x441   : > { %v1646_v42 = vpop.eup %1645 }
 0x442   : > { %v1648_v44 = vpop.eup %1647  ;;  %1649 = vrcp.f32 %v1257_v41  ;;  %v1255_v45 = vadd.f32 1.0, %v1646_v42 }
 0x443   : > { %v1256_v46 = vadd.f32 1.0, %v1648_v44 }
 0x444   : > { %1651 = vrcp.f32 %v1255_v45 }
 0x445   : > { %1653 = vrcp.f32 %v1256_v46 }
 0x44c   : > { %v1650_v50 = vpop.eup %1649 }
 0x44d   : > { %v1266_v53 = vadd.f32 1.0, %v1650_v50 }
 0x44e   : > { %v1652_v55 = vpop.eup %1651 }
 0x44f   : > { %v1654_v56 = vpop.eup %1653  ;;  %v1269_v59 = vmul.f32 %v1266_v53, %v953_v52  ;;  %v1264_v61 = vadd.f32 1.0, %v1652_v55 }
 0x450   : > { %v1265_v62 = vadd.f32 1.0, %v1654_v56 }
 0x451   : > { %v1267_v63 = vmul.f32 %v1264_v61, %v951_v58  ;;  %1273 = vst.msk [vmem:[%s269_s17 + $0x10] sm:$0xff] %vm1272_vm9, %v1269_v59 }
 0x452   : > { %v1268_v57 = vmul.f32 %v1265_v62, %v952_v54 }
 0x453   : > { %1270 = vst [vmem:[%s269_s17] sm:$0xff] %v1267_v63 }
 0x454   : > { %1271 = vst [vmem:[%s269_s17 + $0x8] sm:$0xff] %v1268_v57 }
 0x455   : > { %1698 = shalt.err (!%p1695_p2)
}
 0x456   : > { %s1699_s29 = scalar_lea.hbm %s2271_s12, 384  ;;  %s1703_s28 = scalar_lea.hbm %s2321_s6, 768 }
 0x457   : > { %p1700_p4 = scmp.ne.s32.totalorder %s2271_s12, %s1699_s29  ;;  %p1704_p9 = scmp.lt.u32.totalorder %s2271_s12, %s2321_s6 }
 0x458   : > { %p1705_p1 = scmp.lt.u32.totalorder %s1703_s28, %s1699_s29  ;;  %p1707_p6 = scmp.lt.u32.totalorder %s1699_s29, %s2271_s12 }
 0x459   : > { %p1701_p5 = pnand %p1700_p4, %p2328_p11 }
 0x45a   : > { %p1706_p3 = por %p1705_p1, %p1704_p9 }
 0x45b   : > { %p1702_p7 = pneg %p1701_p5 }
 0x45c   : > { %p1708_p12 = por %p1707_p6, %p1706_p3 }
 0x45e   : > { %p1709_p13 = pnand %p1708_p12, %p1702_p7 }
 0x460   : > { %1712 = shalt.err (!%p1709_p13)
}
 0x461   : > { %1499 = dma.vmem_to_hbm [thread:$0]  (%p2328_p11), %s2273_s26, 384, %s2271_s12, %s1275_s25  }
 0x462 PF: > { %s1301_s17 = sand.u32 1, %s1739_s21   ;;  %p2329_p8 = scmp.ne.s32.totalorder %s2326_s10, 0 }
 0x463   : > { %p2330_p10 = scmp.ge.s32.totalorder %s1751_s24, 2  ;;  %s1302_s7 = scalar_lea.sflag [#allocation6], %s1301_s17 }
 0x465   : > { %p1506_p0 = pnand %p2330_p10, %p2329_p8 }
 0x467   : > { %1734 = dma.done.wait (!%p1506_p0), %s1302_s7, 384  }
 0x468   : > { %1736 = vsyncadd (!%p1506_p0), %s1302_s7, 4294966912  ;;  %p19_p2 = scmp.ge.s32.totalorder %s1840_s27, 4   ;;  %s2331_s21 = smov %s1743_s22 }
 0x469   : > { %s2332_s22 = smov %s1747_s23  ;;  %s2333_s23 = smov %s1852_s30 }
 0x46a   : > { %s2334_s24 = smov %s1840_s27  ;;  %21 = sbr.rel (!%p19_p2) target bundleno = 5 (0x5), region = 89 }
 0x471   :  { %1307 = vsyncpa [#allocation5], 1 }
 0x472   :  { %1309 = vsyncpa [#allocation5 + $0x1], 1 }
 0x473   :  { %1310 = vsyncpa [#allocation6], 1 }
 0x474   :  { %1312 = vsyncpa [#allocation6 + $0x1], 1 }

</bundles_post_ra>
